<compile_context>
chip_gen: v5e
topology: v5e:2x2
jax: 0.10.0
libtpu: 0.0.40
codegen_flags: <defaults>
</compile_context>

<pallas_src>
import functools

import jax
import jax.numpy as jnp
from jax.experimental import pallas as pl
from jax.experimental.pallas import tpu as pltpu

# ---- module hyper-parameters (small but consistent with the PyTorch module) ----
NUM_ATOM_TYPE = 119
NUM_CHIRALITY_TAG = 3
NUM_BOND_TYPE = 5        # incl. self-loop bond type (=4)
NUM_BOND_DIRECTION = 3

NUM_LAYER = 3            # (module default 5; smaller for the synthetic example)
EMB_DIM = 32             # emb_dim (real)
FEAT_DIM = 64            # feat_dim (real)
PRED_N_LAYER = 2
TASKS = 2                # len(task) -> two prediction heads
BN_EPS = 1e-5

LANE = 128               # vreg lane width; every channel dim zero-padded to this
DP = LANE                # padded EMB_DIM
FP = LANE                # padded FEAT_DIM
TP = LANE                # padded TASKS (output lane dim)
HHP = LANE               # padded TASKS * (FEAT_DIM // 2)

assert NUM_LAYER * EMB_DIM <= LANE, "packed edge-message layout needs L*emb_dim <= 128"
assert 2 * EMB_DIM <= LANE and FEAT_DIM <= LANE
assert TASKS * (FEAT_DIM // 2) <= LANE and TASKS <= LANE

_VMEM = pl.BlockSpec(memory_space=pltpu.MemorySpace.VMEM)


def _softplus(x):
    # PyTorch nn.Softplus(beta=1, threshold=20)
    return jnp.where(x > 20.0, x, jnp.log1p(jnp.exp(jnp.minimum(x, 20.0))))


# --------------------------- the single fused Pallas kernel ---------------------------

def ginet_fused_kernel(A_ref, h0_ref, emsg_ref, Wstk_ref, vecs_ref,
                       P_ref, invc_ref, Whead_ref, hvecs_ref,
                       feat_ref, pred_ref):
    A = A_ref[...].astype(jnp.bfloat16)       # int8 from HBM -> bf16 once, reused all layers
    emsg = emsg_ref[...]                      # [N, 128] bf16, all layers lane-packed
    h = h0_ref[...]                           # bf16 on entry, f32 after the first BatchNorm

    # static unroll over layers; all weights stay VMEM-resident.
    # TODO(synk): for large L or N make the layer a grid axis ('arbitrary') streaming
    # Wstk/emsg per step with h in a VMEM scratch, and add a 'parallel' mini-batch axis
    # for v7x's second TensorCore (BatchNorm couples all nodes, so the node axis itself
    # cannot be naively split).
    for l in range(NUM_LAYER):
        v = vecs_ref[l]                       # (4, 128): [b1; b2; gamma; beta]
        # GINE aggregation + first Linear fused on the MXU:
        #   (A @ h) @ W1  +  emsg_packed @ W1_shift[l]
        # W1_shift[l] holds the real W1 rows at row-block [l*emb,(l+1)*emb), zeros
        # elsewhere, so only layer-l's packed lanes contribute.
        aggr = jnp.dot(A, h.astype(jnp.bfloat16), preferred_element_type=jnp.float32)
        z = (jnp.dot(aggr.astype(jnp.bfloat16), Wstk_ref[3 * l + 0],
                     preferred_element_type=jnp.float32)
             + jnp.dot(emsg, Wstk_ref[3 * l + 1], preferred_element_type=jnp.float32)
             + v[0:1])
        z = jnp.maximum(z, 0.0)
        z = jnp.dot(z.astype(jnp.bfloat16), Wstk_ref[3 * l + 2],
                    preferred_element_type=jnp.float32) + v[1:2]
        # BatchNorm1d, training-mode batch statistics (biased var), eps=1e-5; f32 math
        mean = jnp.mean(z, axis=0, keepdims=True)
        var = jnp.mean((z - mean) ** 2, axis=0, keepdims=True)
        z = (z - mean) * (v[2:3] * jax.lax.rsqrt(var + BN_EPS)) + v[3:4]
        # F.dropout(p=0) is identity; ReLU on all but the last layer
        if l != NUM_LAYER - 1:
            z = jnp.maximum(z, 0.0)
        h = z

    # global_mean_pool: exact 0/1 indicator matmul (bf16 MXU, f32 acc) then f32 1/|graph|
    hg = jnp.dot(P_ref[...], h.astype(jnp.bfloat16),
                 preferred_element_type=jnp.float32) * invc_ref[...]
    hv = hvecs_ref[...]                       # (4, 128): [bf; bp1; bp2; bp3]
    feat = jnp.dot(hg.astype(jnp.bfloat16), Whead_ref[0],
                   preferred_element_type=jnp.float32) + hv[0:1]
    feat_ref[...] = feat                      # [B, FP]

    # All prediction heads fused into one matmul chain (block-diagonal / block-structured
    # weights keep heads independent); one lane-dense (B, 128) output.
    z = _softplus(jnp.dot(feat.astype(jnp.bfloat16), Whead_ref[1],
                          preferred_element_type=jnp.float32) + hv[1:2])
    z = _softplus(jnp.dot(z.astype(jnp.bfloat16), Whead_ref[2],
                          preferred_element_type=jnp.float32) + hv[2:3])
    pred_ref[...] = jnp.dot(z.astype(jnp.bfloat16), Whead_ref[3],
                            preferred_element_type=jnp.float32) + hv[3:4]


def ginet_fused(A, h0, emsg, stk, P, invc):
    B = P.shape[0]
    return pl.pallas_call(
        ginet_fused_kernel,
        out_shape=(jax.ShapeDtypeStruct((B, FP), jnp.float32),
                   jax.ShapeDtypeStruct((B, TP), jnp.float32)),
        in_specs=[_VMEM] * 9,
        out_specs=(_VMEM, _VMEM),
        compiler_params=pltpu.CompilerParams(vmem_limit_bytes=64 * 1024 * 1024),
    )(A, h0, emsg, stk["Wstk"], stk["vecs"], P, invc, stk["Whead"], stk["hvecs"])


# --------------------------- parameter init (deterministic, synthetic, padded) ----------

def _lin(key, fan_in, fan_out):
    kw, kb = jax.random.split(key)
    scale = 1.0 / jnp.sqrt(fan_in)
    W = jax.random.uniform(kw, (fan_in, fan_out), jnp.float32, -scale, scale)
    b = jax.random.uniform(kb, (1, fan_out), jnp.float32, -scale, scale)
    return W, b


def _pad2(M, rows=LANE, cols=LANE):
    """Zero-pad a 2-D matrix into the top-left corner of a [rows, cols] slab."""
    out = jnp.zeros((rows, cols), jnp.float32)
    return out.at[:M.shape[0], :M.shape[1]].set(M)


def _padvec(v, width=LANE):
    out = jnp.zeros((width,), jnp.float32)
    return out.at[:v.shape[0]].set(v)


def init_params(key):
    keys = jax.random.split(key, 8 + NUM_LAYER + TASKS)
    params = {}
    # Node-embedding tables at real width (gathered in glue, then channel-padded once).
    params["x_embedding1"] = jax.random.normal(keys[0], (NUM_ATOM_TYPE, EMB_DIM)) * 0.1
    params["x_embedding2"] = jax.random.normal(keys[1], (NUM_CHIRALITY_TAG, EMB_DIM)) * 0.1

    edge1, edge2 = [], []
    Wflat, vecs_l = [], []
    for l in range(NUM_LAYER):
        k = jax.random.split(keys[2 + l], 4)
        W1, b1 = _lin(k[0], EMB_DIM, 2 * EMB_DIM)
        W2, b2 = _lin(k[1], 2 * EMB_DIM, EMB_DIM)
        edge1.append(jax.random.normal(k[2], (NUM_BOND_TYPE, EMB_DIM)) * 0.1)
        edge2.append(jax.random.normal(k[3], (NUM_BOND_DIRECTION, EMB_DIM)) * 0.1)
        # W1 at rows 0:emb (reads A@h lanes); W1_shift at rows l*emb:(l+1)*emb (reads the
        # packed edge-message lanes of layer l); W2 standard.
        W1p = _pad2(W1)
        W1s = jnp.zeros((LANE, LANE), jnp.float32).at[
            l * EMB_DIM:(l + 1) * EMB_DIM, :2 * EMB_DIM].set(W1)
        W2p = _pad2(W2)
        Wflat += [W1p, W1s, W2p]
        gamma = jnp.zeros((LANE,), jnp.float32).at[:EMB_DIM].set(1.0)
        beta = jnp.zeros((LANE,), jnp.float32)
        vecs_l.append(jnp.stack([_padvec(b1[0]), _padvec(b2[0]), gamma, beta]))
    params["edge_emb1"] = edge1
    params["edge_emb2"] = edge2

    stk = {
        "Wstk": jnp.stack(Wflat).astype(jnp.bfloat16),   # [L*3, 128, 128] bf16 MXU slab
        "vecs": jnp.stack(vecs_l),                       # [L, 4, 128] f32 (b1,b2,gamma,beta)
    }

    Wf, bf = _lin(keys[2 + NUM_LAYER], EMB_DIM, FEAT_DIM)

    # Fuse the TASKS heads: W1 concatenated along output lanes, W2 block-diagonal,
    # W3 block-structured into a [HHP, TP] matrix (one column per task).
    half = FEAT_DIM // 2
    Wp1 = jnp.zeros((FP, HHP), jnp.float32)
    bp1 = jnp.zeros((HHP,), jnp.float32)
    Wp2 = jnp.zeros((HHP, HHP), jnp.float32)
    bp2 = jnp.zeros((HHP,), jnp.float32)
    Wp3 = jnp.zeros((HHP, TP), jnp.float32)
    bp3 = jnp.zeros((TP,), jnp.float32)
    for t in range(TASKS):
        k = jax.random.split(keys[3 + NUM_LAYER + t], 3)
        W1h, b1h = _lin(k[0], FEAT_DIM, half)
        W2h, b2h = _lin(k[1], half, half)
        W3h, b3h = _lin(k[2], half, 1)
        c0, c1 = t * half, (t + 1) * half
        Wp1 = Wp1.at[:FEAT_DIM, c0:c1].set(W1h)
        bp1 = bp1.at[c0:c1].set(b1h[0])
        Wp2 = Wp2.at[c0:c1, c0:c1].set(W2h)
        bp2 = bp2.at[c0:c1].set(b2h[0])
        Wp3 = Wp3.at[c0:c1, t:t + 1].set(W3h)
        bp3 = bp3.at[t].set(b3h[0, 0])

    stk["Whead"] = jnp.stack([_pad2(Wf), Wp1, Wp2, Wp3]).astype(jnp.bfloat16)  # [4,128,128]
    stk["hvecs"] = jnp.stack([_padvec(bf[0]), bp1, bp2, bp3])                  # [4,128] f32
    params["stk"] = stk
    return params


# --------------------------- forward (glue + single fused kernel) ---------------------------

def ginet_mtl_forward(params, x_nodes, edge_index, edge_attr, batch, num_graphs):
    N = x_nodes.shape[0]

    # Node embeddings (gather -> glue), padded to 128 lanes, shipped bf16.
    # TODO(synk): embedding gathers / scatter-adds stay in XLA glue (no clean tiled Pallas
    # gather at these sizes); if graph topology repeats across calls, hoist the dense-A and
    # emsg construction out of the jitted forward entirely.
    h0 = (params["x_embedding1"][x_nodes[:, 0]]
          + params["x_embedding2"][x_nodes[:, 1]]).astype(jnp.float32)
    h0 = jnp.pad(h0, ((0, 0), (0, DP - EMB_DIM))).astype(jnp.bfloat16)

    # Add self loops: edge (i -> i) with edge_attr [4, 0]  (GINEConv.forward)
    self_idx = jnp.arange(N, dtype=edge_index.dtype)
    ei = jnp.concatenate([edge_index, jnp.stack([self_idx, self_idx])], axis=1)
    self_attr = jnp.concatenate(
        [jnp.full((N, 1), NUM_BOND_TYPE - 1, edge_attr.dtype),
         jnp.zeros((N, 1), edge_attr.dtype)], axis=1)
    ea = jnp.concatenate([edge_attr, self_attr], axis=0)
    src, dst = ei[0], ei[1]

    # Dense adjacency shipped as int8 (tiny exact integer multiplicities); cast to bf16
    # once in-kernel.  TODO(synk): on v7x ship A as fp8 e4m3 and feed the MXU directly.
    A = jnp.zeros((N, N), jnp.int32).at[dst, src].add(1).astype(jnp.int8)

    # Per-layer edge messages reduced to [N, emb] in glue, lane-PACKED into one bf16
    # [N, 128] slab: layer l occupies lanes [l*emb, (l+1)*emb).
    msgs = []
    for l in range(NUM_LAYER):
        Ee = (params["edge_emb1"][l][ea[:, 0]]
              + params["edge_emb2"][l][ea[:, 1]]).astype(jnp.float32)
        msgs.append(jnp.zeros((N, EMB_DIM), jnp.float32).at[dst].add(Ee))
    emsg = jnp.concatenate(msgs, axis=1)
    emsg = jnp.pad(emsg, ((0, 0), (0, LANE - NUM_LAYER * EMB_DIM))).astype(jnp.bfloat16)

    # Mean-pool: exact 0/1 indicator (bf16) + f32 reciprocal counts (guard empty graphs).
    counts = jnp.zeros((num_graphs,), jnp.float32).at[batch].add(1.0)
    P = (jnp.zeros((num_graphs, N), jnp.float32)
         .at[batch, jnp.arange(N)].set(1.0)).astype(jnp.bfloat16)
    invc = (1.0 / jnp.maximum(counts, 1.0))[:, None]

    feat_p, pred_p = ginet_fused(A, h0, emsg, params["stk"], P, invc)
    return feat_p[:, :FEAT_DIM], pred_p[:, :TASKS]


# --------------------------- example ---------------------------

if __name__ == "__main__":
    key = jax.random.PRNGKey(0)
    k_param, k_atom, k_chir, k_bond, k_dir = jax.random.split(key, 5)

    params = init_params(k_param)

    # 8 ring graphs of 16 nodes each -> N = 128 nodes total (fills the MXU row dim;
    # real workloads should batch many more graphs per call).
    N_PER, B = 16, 8
    N = N_PER * B
    x_nodes = jnp.stack(
        [jax.random.randint(k_atom, (N,), 0, NUM_ATOM_TYPE, jnp.int32),
         jax.random.randint(k_chir, (N,), 0, NUM_CHIRALITY_TAG, jnp.int32)], axis=1)

    srcs, dsts = [], []
    for g in range(B):
        off = g * N_PER
        for i in range(N_PER):
            j = (i + 1) % N_PER
            srcs += [off + i, off + j]
            dsts += [off + j, off + i]
    edge_index = jnp.array([srcs, dsts], dtype=jnp.int32)     # [2, 256]
    E_dir = edge_index.shape[1]
    edge_attr = jnp.stack(
        [jax.random.randint(k_bond, (E_dir,), 0, NUM_BOND_TYPE - 1, jnp.int32),
         jax.random.randint(k_dir, (E_dir,), 0, NUM_BOND_DIRECTION, jnp.int32)], axis=1)
    batch = jnp.repeat(jnp.arange(B, dtype=jnp.int32), N_PER)

    feat, preds = jax.jit(
        functools.partial(ginet_mtl_forward, num_graphs=B)
    )(params, x_nodes, edge_index, edge_attr, batch)
    jax.block_until_ready((feat, preds))

    assert feat.shape == (B, FEAT_DIM) and preds.shape == (B, TASKS)
    assert bool(jnp.all(jnp.isfinite(feat))) and bool(jnp.all(jnp.isfinite(preds)))
    print("KERNEL_OK")
</pallas_src>

<mosaic_0001>
module attributes {stable_mosaic.version = 11 : i64} {
  func.func @ginet_fused_kernel(%arg0: memref<128x128xi8, #tpu.memory_space<vmem>>, %arg1: memref<128x128xbf16, #tpu.memory_space<vmem>>, %arg2: memref<128x128xbf16, #tpu.memory_space<vmem>>, %arg3: memref<9x128x128xbf16, #tpu.memory_space<vmem>>, %arg4: memref<3x4x128xf32, #tpu.memory_space<vmem>>, %arg5: memref<8x128xbf16, #tpu.memory_space<vmem>>, %arg6: memref<8x1xf32, #tpu.memory_space<vmem>>, %arg7: memref<4x128x128xbf16, #tpu.memory_space<vmem>>, %arg8: memref<4x128xf32, #tpu.memory_space<vmem>>, %arg9: memref<8x128xf32, #tpu.memory_space<vmem>>, %arg10: memref<8x128xf32, #tpu.memory_space<vmem>>) attributes {dimension_semantics = [], scalar_prefetch = 0 : i64, scratch_operands = 0 : i64, tpu.core_type = #tpu.core_type<tc>} {
    %c0 = arith.constant 0 : index
    %c0_0 = arith.constant 0 : index
    %0 = vector.load %arg0[%c0, %c0_0] : memref<128x128xi8, #tpu.memory_space<vmem>>, vector<128x128xi8>
    %1 = arith.sitofp %0 : vector<128x128xi8> to vector<128x128xbf16>
    %c0_1 = arith.constant 0 : index
    %c0_2 = arith.constant 0 : index
    %2 = vector.load %arg2[%c0_1, %c0_2] : memref<128x128xbf16, #tpu.memory_space<vmem>>, vector<128x128xbf16>
    %c0_3 = arith.constant 0 : index
    %c0_4 = arith.constant 0 : index
    %3 = vector.load %arg1[%c0_3, %c0_4] : memref<128x128xbf16, #tpu.memory_space<vmem>>, vector<128x128xbf16>
    %c0_5 = arith.constant 0 : index
    %c0_6 = arith.constant 0 : index
    %c0_7 = arith.constant 0 : index
    %4 = vector.load %arg4[%c0_5, %c0_6, %c0_7] : memref<3x4x128xf32, #tpu.memory_space<vmem>>, vector<1x4x128xf32>
    %5 = vector.shape_cast %4 : vector<1x4x128xf32> to vector<4x128xf32>
    %cst = arith.constant dense<0.000000e+00> : vector<128x128xf32>
    %6 = tpu.matmul %1, %3, %cst {dimension_numbers = #tpu.dot_dimension_numbers<[1], [0], [0], [1], [0, 0, 1, 1], [], []>} : vector<128x128xbf16>, vector<128x128xbf16>, vector<128x128xf32> -> vector<128x128xf32>
    %7 = arith.truncf %6 : vector<128x128xf32> to vector<128x128xbf16>
    %c0_8 = arith.constant 0 : index
    %c0_9 = arith.constant 0 : index
    %c0_10 = arith.constant 0 : index
    %8 = vector.load %arg3[%c0_8, %c0_9, %c0_10] : memref<9x128x128xbf16, #tpu.memory_space<vmem>>, vector<1x128x128xbf16>
    %9 = vector.shape_cast %8 : vector<1x128x128xbf16> to vector<128x128xbf16>
    %cst_11 = arith.constant dense<0.000000e+00> : vector<128x128xf32>
    %10 = tpu.matmul %7, %9, %cst_11 {dimension_numbers = #tpu.dot_dimension_numbers<[1], [0], [0], [1], [0, 0, 1, 1], [], []>} : vector<128x128xbf16>, vector<128x128xbf16>, vector<128x128xf32> -> vector<128x128xf32>
    %c1 = arith.constant 1 : index
    %c0_12 = arith.constant 0 : index
    %c0_13 = arith.constant 0 : index
    %11 = vector.load %arg3[%c1, %c0_12, %c0_13] : memref<9x128x128xbf16, #tpu.memory_space<vmem>>, vector<1x128x128xbf16>
    %12 = vector.shape_cast %11 : vector<1x128x128xbf16> to vector<128x128xbf16>
    %cst_14 = arith.constant dense<0.000000e+00> : vector<128x128xf32>
    %13 = tpu.matmul %2, %12, %cst_14 {dimension_numbers = #tpu.dot_dimension_numbers<[1], [0], [0], [1], [0, 0, 1, 1], [], []>} : vector<128x128xbf16>, vector<128x128xbf16>, vector<128x128xf32> -> vector<128x128xf32>
    %14 = arith.addf %10, %13 : vector<128x128xf32>
    %15 = vector.extract_strided_slice %5 {offsets = [0, 0], sizes = [1, 128], strides = [1, 1]} : vector<4x128xf32> to vector<1x128xf32>
    %16 = vector.broadcast %15 : vector<1x128xf32> to vector<128x128xf32>
    %17 = arith.addf %14, %16 : vector<128x128xf32>
    %cst_15 = arith.constant 0.000000e+00 : f32
    %18 = vector.broadcast %cst_15 : f32 to vector<128x128xf32>
    %19 = arith.maximumf %17, %18 : vector<128x128xf32>
    %20 = arith.truncf %19 : vector<128x128xf32> to vector<128x128xbf16>
    %c2 = arith.constant 2 : index
    %c0_16 = arith.constant 0 : index
    %c0_17 = arith.constant 0 : index
    %21 = vector.load %arg3[%c2, %c0_16, %c0_17] : memref<9x128x128xbf16, #tpu.memory_space<vmem>>, vector<1x128x128xbf16>
    %22 = vector.shape_cast %21 : vector<1x128x128xbf16> to vector<128x128xbf16>
    %cst_18 = arith.constant dense<0.000000e+00> : vector<128x128xf32>
    %23 = tpu.matmul %20, %22, %cst_18 {dimension_numbers = #tpu.dot_dimension_numbers<[1], [0], [0], [1], [0, 0, 1, 1], [], []>} : vector<128x128xbf16>, vector<128x128xbf16>, vector<128x128xf32> -> vector<128x128xf32>
    %24 = vector.extract_strided_slice %5 {offsets = [1, 0], sizes = [1, 128], strides = [1, 1]} : vector<4x128xf32> to vector<1x128xf32>
    %25 = vector.broadcast %24 : vector<1x128xf32> to vector<128x128xf32>
    %26 = arith.addf %23, %25 : vector<128x128xf32>
    %cst_19 = arith.constant dense<0.000000e+00> : vector<128xf32>
    %27 = vector.multi_reduction <add>, %26, %cst_19 [0] : vector<128x128xf32> to vector<128xf32>
    %28 = vector.shape_cast %27 : vector<128xf32> to vector<1x128xf32>
    %cst_20 = arith.constant 1.280000e+02 : f32
    %29 = vector.broadcast %cst_20 : f32 to vector<1x128xf32>
    %30 = arith.divf %28, %29 : vector<1x128xf32>
    %31 = vector.broadcast %30 : vector<1x128xf32> to vector<128x128xf32>
    %32 = arith.subf %26, %31 : vector<128x128xf32>
    %33 = arith.mulf %32, %32 : vector<128x128xf32>
    %cst_21 = arith.constant dense<0.000000e+00> : vector<128xf32>
    %34 = vector.multi_reduction <add>, %33, %cst_21 [0] : vector<128x128xf32> to vector<128xf32>
    %35 = vector.shape_cast %34 : vector<128xf32> to vector<1x128xf32>
    %cst_22 = arith.constant 1.280000e+02 : f32
    %36 = vector.broadcast %cst_22 : f32 to vector<1x128xf32>
    %37 = arith.divf %35, %36 : vector<1x128xf32>
    %38 = vector.broadcast %30 : vector<1x128xf32> to vector<128x128xf32>
    %39 = arith.subf %26, %38 : vector<128x128xf32>
    %40 = vector.extract_strided_slice %5 {offsets = [2, 0], sizes = [1, 128], strides = [1, 1]} : vector<4x128xf32> to vector<1x128xf32>
    %cst_23 = arith.constant 9.99999974E-6 : f32
    %41 = vector.broadcast %cst_23 : f32 to vector<1x128xf32>
    %42 = arith.addf %37, %41 : vector<1x128xf32>
    %43 = math.rsqrt %42 : vector<1x128xf32>
    %44 = arith.mulf %40, %43 : vector<1x128xf32>
    %45 = vector.broadcast %44 : vector<1x128xf32> to vector<128x128xf32>
    %46 = arith.mulf %39, %45 : vector<128x128xf32>
    %47 = vector.extract_strided_slice %5 {offsets = [3, 0], sizes = [1, 128], strides = [1, 1]} : vector<4x128xf32> to vector<1x128xf32>
    %48 = vector.broadcast %47 : vector<1x128xf32> to vector<128x128xf32>
    %49 = arith.addf %46, %48 : vector<128x128xf32>
    %cst_24 = arith.constant 0.000000e+00 : f32
    %50 = vector.broadcast %cst_24 : f32 to vector<128x128xf32>
    %51 = arith.maximumf %49, %50 : vector<128x128xf32>
    %c1_25 = arith.constant 1 : index
    %c0_26 = arith.constant 0 : index
    %c0_27 = arith.constant 0 : index
    %52 = vector.load %arg4[%c1_25, %c0_26, %c0_27] : memref<3x4x128xf32, #tpu.memory_space<vmem>>, vector<1x4x128xf32>
    %53 = vector.shape_cast %52 : vector<1x4x128xf32> to vector<4x128xf32>
    %54 = arith.truncf %51 : vector<128x128xf32> to vector<128x128xbf16>
    %cst_28 = arith.constant dense<0.000000e+00> : vector<128x128xf32>
    %55 = tpu.matmul %1, %54, %cst_28 {dimension_numbers = #tpu.dot_dimension_numbers<[1], [0], [0], [1], [0, 0, 1, 1], [], []>} : vector<128x128xbf16>, vector<128x128xbf16>, vector<128x128xf32> -> vector<128x128xf32>
    %56 = arith.truncf %55 : vector<128x128xf32> to vector<128x128xbf16>
    %c3 = arith.constant 3 : index
    %c0_29 = arith.constant 0 : index
    %c0_30 = arith.constant 0 : index
    %57 = vector.load %arg3[%c3, %c0_29, %c0_30] : memref<9x128x128xbf16, #tpu.memory_space<vmem>>, vector<1x128x128xbf16>
    %58 = vector.shape_cast %57 : vector<1x128x128xbf16> to vector<128x128xbf16>
    %cst_31 = arith.constant dense<0.000000e+00> : vector<128x128xf32>
    %59 = tpu.matmul %56, %58, %cst_31 {dimension_numbers = #tpu.dot_dimension_numbers<[1], [0], [0], [1], [0, 0, 1, 1], [], []>} : vector<128x128xbf16>, vector<128x128xbf16>, vector<128x128xf32> -> vector<128x128xf32>
    %c4 = arith.constant 4 : index
    %c0_32 = arith.constant 0 : index
    %c0_33 = arith.constant 0 : index
    %60 = vector.load %arg3[%c4, %c0_32, %c0_33] : memref<9x128x128xbf16, #tpu.memory_space<vmem>>, vector<1x128x128xbf16>
    %61 = vector.shape_cast %60 : vector<1x128x128xbf16> to vector<128x128xbf16>
    %cst_34 = arith.constant dense<0.000000e+00> : vector<128x128xf32>
    %62 = tpu.matmul %2, %61, %cst_34 {dimension_numbers = #tpu.dot_dimension_numbers<[1], [0], [0], [1], [0, 0, 1, 1], [], []>} : vector<128x128xbf16>, vector<128x128xbf16>, vector<128x128xf32> -> vector<128x128xf32>
    %63 = arith.addf %59, %62 : vector<128x128xf32>
    %64 = vector.extract_strided_slice %53 {offsets = [0, 0], sizes = [1, 128], strides = [1, 1]} : vector<4x128xf32> to vector<1x128xf32>
    %65 = vector.broadcast %64 : vector<1x128xf32> to vector<128x128xf32>
    %66 = arith.addf %63, %65 : vector<128x128xf32>
    %cst_35 = arith.constant 0.000000e+00 : f32
    %67 = vector.broadcast %cst_35 : f32 to vector<128x128xf32>
    %68 = arith.maximumf %66, %67 : vector<128x128xf32>
    %69 = arith.truncf %68 : vector<128x128xf32> to vector<128x128xbf16>
    %c5 = arith.constant 5 : index
    %c0_36 = arith.constant 0 : index
    %c0_37 = arith.constant 0 : index
    %70 = vector.load %arg3[%c5, %c0_36, %c0_37] : memref<9x128x128xbf16, #tpu.memory_space<vmem>>, vector<1x128x128xbf16>
    %71 = vector.shape_cast %70 : vector<1x128x128xbf16> to vector<128x128xbf16>
    %cst_38 = arith.constant dense<0.000000e+00> : vector<128x128xf32>
    %72 = tpu.matmul %69, %71, %cst_38 {dimension_numbers = #tpu.dot_dimension_numbers<[1], [0], [0], [1], [0, 0, 1, 1], [], []>} : vector<128x128xbf16>, vector<128x128xbf16>, vector<128x128xf32> -> vector<128x128xf32>
    %73 = vector.extract_strided_slice %53 {offsets = [1, 0], sizes = [1, 128], strides = [1, 1]} : vector<4x128xf32> to vector<1x128xf32>
    %74 = vector.broadcast %73 : vector<1x128xf32> to vector<128x128xf32>
    %75 = arith.addf %72, %74 : vector<128x128xf32>
    %cst_39 = arith.constant dense<0.000000e+00> : vector<128xf32>
    %76 = vector.multi_reduction <add>, %75, %cst_39 [0] : vector<128x128xf32> to vector<128xf32>
    %77 = vector.shape_cast %76 : vector<128xf32> to vector<1x128xf32>
    %cst_40 = arith.constant 1.280000e+02 : f32
    %78 = vector.broadcast %cst_40 : f32 to vector<1x128xf32>
    %79 = arith.divf %77, %78 : vector<1x128xf32>
    %80 = vector.broadcast %79 : vector<1x128xf32> to vector<128x128xf32>
    %81 = arith.subf %75, %80 : vector<128x128xf32>
    %82 = arith.mulf %81, %81 : vector<128x128xf32>
    %cst_41 = arith.constant dense<0.000000e+00> : vector<128xf32>
    %83 = vector.multi_reduction <add>, %82, %cst_41 [0] : vector<128x128xf32> to vector<128xf32>
    %84 = vector.shape_cast %83 : vector<128xf32> to vector<1x128xf32>
    %cst_42 = arith.constant 1.280000e+02 : f32
    %85 = vector.broadcast %cst_42 : f32 to vector<1x128xf32>
    %86 = arith.divf %84, %85 : vector<1x128xf32>
    %87 = vector.broadcast %79 : vector<1x128xf32> to vector<128x128xf32>
    %88 = arith.subf %75, %87 : vector<128x128xf32>
    %89 = vector.extract_strided_slice %53 {offsets = [2, 0], sizes = [1, 128], strides = [1, 1]} : vector<4x128xf32> to vector<1x128xf32>
    %cst_43 = arith.constant 9.99999974E-6 : f32
    %90 = vector.broadcast %cst_43 : f32 to vector<1x128xf32>
    %91 = arith.addf %86, %90 : vector<1x128xf32>
    %92 = math.rsqrt %91 : vector<1x128xf32>
    %93 = arith.mulf %89, %92 : vector<1x128xf32>
    %94 = vector.broadcast %93 : vector<1x128xf32> to vector<128x128xf32>
    %95 = arith.mulf %88, %94 : vector<128x128xf32>
    %96 = vector.extract_strided_slice %53 {offsets = [3, 0], sizes = [1, 128], strides = [1, 1]} : vector<4x128xf32> to vector<1x128xf32>
    %97 = vector.broadcast %96 : vector<1x128xf32> to vector<128x128xf32>
    %98 = arith.addf %95, %97 : vector<128x128xf32>
    %cst_44 = arith.constant 0.000000e+00 : f32
    %99 = vector.broadcast %cst_44 : f32 to vector<128x128xf32>
    %100 = arith.maximumf %98, %99 : vector<128x128xf32>
    %c2_45 = arith.constant 2 : index
    %c0_46 = arith.constant 0 : index
    %c0_47 = arith.constant 0 : index
    %101 = vector.load %arg4[%c2_45, %c0_46, %c0_47] : memref<3x4x128xf32, #tpu.memory_space<vmem>>, vector<1x4x128xf32>
    %102 = vector.shape_cast %101 : vector<1x4x128xf32> to vector<4x128xf32>
    %103 = arith.truncf %100 : vector<128x128xf32> to vector<128x128xbf16>
    %cst_48 = arith.constant dense<0.000000e+00> : vector<128x128xf32>
    %104 = tpu.matmul %1, %103, %cst_48 {dimension_numbers = #tpu.dot_dimension_numbers<[1], [0], [0], [1], [0, 0, 1, 1], [], []>} : vector<128x128xbf16>, vector<128x128xbf16>, vector<128x128xf32> -> vector<128x128xf32>
    %105 = arith.truncf %104 : vector<128x128xf32> to vector<128x128xbf16>
    %c6 = arith.constant 6 : index
    %c0_49 = arith.constant 0 : index
    %c0_50 = arith.constant 0 : index
    %106 = vector.load %arg3[%c6, %c0_49, %c0_50] : memref<9x128x128xbf16, #tpu.memory_space<vmem>>, vector<1x128x128xbf16>
    %107 = vector.shape_cast %106 : vector<1x128x128xbf16> to vector<128x128xbf16>
    %cst_51 = arith.constant dense<0.000000e+00> : vector<128x128xf32>
    %108 = tpu.matmul %105, %107, %cst_51 {dimension_numbers = #tpu.dot_dimension_numbers<[1], [0], [0], [1], [0, 0, 1, 1], [], []>} : vector<128x128xbf16>, vector<128x128xbf16>, vector<128x128xf32> -> vector<128x128xf32>
    %c7 = arith.constant 7 : index
    %c0_52 = arith.constant 0 : index
    %c0_53 = arith.constant 0 : index
    %109 = vector.load %arg3[%c7, %c0_52, %c0_53] : memref<9x128x128xbf16, #tpu.memory_space<vmem>>, vector<1x128x128xbf16>
    %110 = vector.shape_cast %109 : vector<1x128x128xbf16> to vector<128x128xbf16>
    %cst_54 = arith.constant dense<0.000000e+00> : vector<128x128xf32>
    %111 = tpu.matmul %2, %110, %cst_54 {dimension_numbers = #tpu.dot_dimension_numbers<[1], [0], [0], [1], [0, 0, 1, 1], [], []>} : vector<128x128xbf16>, vector<128x128xbf16>, vector<128x128xf32> -> vector<128x128xf32>
    %112 = arith.addf %108, %111 : vector<128x128xf32>
    %113 = vector.extract_strided_slice %102 {offsets = [0, 0], sizes = [1, 128], strides = [1, 1]} : vector<4x128xf32> to vector<1x128xf32>
    %114 = vector.broadcast %113 : vector<1x128xf32> to vector<128x128xf32>
    %115 = arith.addf %112, %114 : vector<128x128xf32>
    %cst_55 = arith.constant 0.000000e+00 : f32
    %116 = vector.broadcast %cst_55 : f32 to vector<128x128xf32>
    %117 = arith.maximumf %115, %116 : vector<128x128xf32>
    %118 = arith.truncf %117 : vector<128x128xf32> to vector<128x128xbf16>
    %c8 = arith.constant 8 : index
    %c0_56 = arith.constant 0 : index
    %c0_57 = arith.constant 0 : index
    %119 = vector.load %arg3[%c8, %c0_56, %c0_57] : memref<9x128x128xbf16, #tpu.memory_space<vmem>>, vector<1x128x128xbf16>
    %120 = vector.shape_cast %119 : vector<1x128x128xbf16> to vector<128x128xbf16>
    %cst_58 = arith.constant dense<0.000000e+00> : vector<128x128xf32>
    %121 = tpu.matmul %118, %120, %cst_58 {dimension_numbers = #tpu.dot_dimension_numbers<[1], [0], [0], [1], [0, 0, 1, 1], [], []>} : vector<128x128xbf16>, vector<128x128xbf16>, vector<128x128xf32> -> vector<128x128xf32>
    %122 = vector.extract_strided_slice %102 {offsets = [1, 0], sizes = [1, 128], strides = [1, 1]} : vector<4x128xf32> to vector<1x128xf32>
    %123 = vector.broadcast %122 : vector<1x128xf32> to vector<128x128xf32>
    %124 = arith.addf %121, %123 : vector<128x128xf32>
    %cst_59 = arith.constant dense<0.000000e+00> : vector<128xf32>
    %125 = vector.multi_reduction <add>, %124, %cst_59 [0] : vector<128x128xf32> to vector<128xf32>
    %126 = vector.shape_cast %125 : vector<128xf32> to vector<1x128xf32>
    %cst_60 = arith.constant 1.280000e+02 : f32
    %127 = vector.broadcast %cst_60 : f32 to vector<1x128xf32>
    %128 = arith.divf %126, %127 : vector<1x128xf32>
    %129 = vector.broadcast %128 : vector<1x128xf32> to vector<128x128xf32>
    %130 = arith.subf %124, %129 : vector<128x128xf32>
    %131 = arith.mulf %130, %130 : vector<128x128xf32>
    %cst_61 = arith.constant dense<0.000000e+00> : vector<128xf32>
    %132 = vector.multi_reduction <add>, %131, %cst_61 [0] : vector<128x128xf32> to vector<128xf32>
    %133 = vector.shape_cast %132 : vector<128xf32> to vector<1x128xf32>
    %cst_62 = arith.constant 1.280000e+02 : f32
    %134 = vector.broadcast %cst_62 : f32 to vector<1x128xf32>
    %135 = arith.divf %133, %134 : vector<1x128xf32>
    %136 = vector.broadcast %128 : vector<1x128xf32> to vector<128x128xf32>
    %137 = arith.subf %124, %136 : vector<128x128xf32>
    %138 = vector.extract_strided_slice %102 {offsets = [2, 0], sizes = [1, 128], strides = [1, 1]} : vector<4x128xf32> to vector<1x128xf32>
    %cst_63 = arith.constant 9.99999974E-6 : f32
    %139 = vector.broadcast %cst_63 : f32 to vector<1x128xf32>
    %140 = arith.addf %135, %139 : vector<1x128xf32>
    %141 = math.rsqrt %140 : vector<1x128xf32>
    %142 = arith.mulf %138, %141 : vector<1x128xf32>
    %143 = vector.broadcast %142 : vector<1x128xf32> to vector<128x128xf32>
    %144 = arith.mulf %137, %143 : vector<128x128xf32>
    %145 = vector.extract_strided_slice %102 {offsets = [3, 0], sizes = [1, 128], strides = [1, 1]} : vector<4x128xf32> to vector<1x128xf32>
    %146 = vector.broadcast %145 : vector<1x128xf32> to vector<128x128xf32>
    %147 = arith.addf %144, %146 : vector<128x128xf32>
    %c0_64 = arith.constant 0 : index
    %c0_65 = arith.constant 0 : index
    %148 = vector.load %arg5[%c0_64, %c0_65] : memref<8x128xbf16, #tpu.memory_space<vmem>>, vector<8x128xbf16>
    %149 = arith.truncf %147 : vector<128x128xf32> to vector<128x128xbf16>
    %cst_66 = arith.constant dense<0.000000e+00> : vector<8x128xf32>
    %150 = tpu.matmul %148, %149, %cst_66 {dimension_numbers = #tpu.dot_dimension_numbers<[1], [0], [0], [1], [0, 0, 1, 1], [], []>} : vector<8x128xbf16>, vector<128x128xbf16>, vector<8x128xf32> -> vector<8x128xf32>
    %c0_67 = arith.constant 0 : index
    %c0_68 = arith.constant 0 : index
    %151 = vector.load %arg6[%c0_67, %c0_68] : memref<8x1xf32, #tpu.memory_space<vmem>>, vector<8x1xf32>
    %152 = vector.broadcast %151 : vector<8x1xf32> to vector<8x128xf32>
    %153 = arith.mulf %150, %152 : vector<8x128xf32>
    %c0_69 = arith.constant 0 : index
    %c0_70 = arith.constant 0 : index
    %154 = vector.load %arg8[%c0_69, %c0_70] : memref<4x128xf32, #tpu.memory_space<vmem>>, vector<4x128xf32>
    %155 = arith.truncf %153 : vector<8x128xf32> to vector<8x128xbf16>
    %c0_71 = arith.constant 0 : index
    %c0_72 = arith.constant 0 : index
    %c0_73 = arith.constant 0 : index
    %156 = vector.load %arg7[%c0_71, %c0_72, %c0_73] : memref<4x128x128xbf16, #tpu.memory_space<vmem>>, vector<1x128x128xbf16>
    %157 = vector.shape_cast %156 : vector<1x128x128xbf16> to vector<128x128xbf16>
    %cst_74 = arith.constant dense<0.000000e+00> : vector<8x128xf32>
    %158 = tpu.matmul %155, %157, %cst_74 {dimension_numbers = #tpu.dot_dimension_numbers<[1], [0], [0], [1], [0, 0, 1, 1], [], []>} : vector<8x128xbf16>, vector<128x128xbf16>, vector<8x128xf32> -> vector<8x128xf32>
    %159 = vector.extract_strided_slice %154 {offsets = [0, 0], sizes = [1, 128], strides = [1, 1]} : vector<4x128xf32> to vector<1x128xf32>
    %160 = vector.broadcast %159 : vector<1x128xf32> to vector<8x128xf32>
    %161 = arith.addf %158, %160 : vector<8x128xf32>
    %c0_75 = arith.constant 0 : index
    %c0_76 = arith.constant 0 : index
    %162 = vector.load %arg9[%c0_75, %c0_76] : memref<8x128xf32, #tpu.memory_space<vmem>>, vector<8x128xf32>
    tpu.vector_store %arg9[%c0_75, %c0_76], %161 {strides = array<i32>} : memref<8x128xf32, #tpu.memory_space<vmem>>, vector<8x128xf32>,
    %163 = arith.truncf %161 : vector<8x128xf32> to vector<8x128xbf16>
    %c1_77 = arith.constant 1 : index
    %c0_78 = arith.constant 0 : index
    %c0_79 = arith.constant 0 : index
    %164 = vector.load %arg7[%c1_77, %c0_78, %c0_79] : memref<4x128x128xbf16, #tpu.memory_space<vmem>>, vector<1x128x128xbf16>
    %165 = vector.shape_cast %164 : vector<1x128x128xbf16> to vector<128x128xbf16>
    %cst_80 = arith.constant dense<0.000000e+00> : vector<8x128xf32>
    %166 = tpu.matmul %163, %165, %cst_80 {dimension_numbers = #tpu.dot_dimension_numbers<[1], [0], [0], [1], [0, 0, 1, 1], [], []>} : vector<8x128xbf16>, vector<128x128xbf16>, vector<8x128xf32> -> vector<8x128xf32>
    %167 = vector.extract_strided_slice %154 {offsets = [1, 0], sizes = [1, 128], strides = [1, 1]} : vector<4x128xf32> to vector<1x128xf32>
    %168 = vector.broadcast %167 : vector<1x128xf32> to vector<8x128xf32>
    %169 = arith.addf %166, %168 : vector<8x128xf32>
    %cst_81 = arith.constant 2.000000e+01 : f32
    %170 = vector.broadcast %cst_81 : f32 to vector<8x128xf32>
    %171 = arith.cmpf ogt, %169, %170 : vector<8x128xf32>
    %cst_82 = arith.constant 2.000000e+01 : f32
    %172 = vector.broadcast %cst_82 : f32 to vector<8x128xf32>
    %173 = arith.minimumf %169, %172 : vector<8x128xf32>
    %174 = math.exp %173 : vector<8x128xf32>
    %175 = math.log1p %174 : vector<8x128xf32>
    %176 = arith.select %171, %169, %175 : vector<8x128xi1>, vector<8x128xf32>
    %177 = arith.truncf %176 : vector<8x128xf32> to vector<8x128xbf16>
    %c2_83 = arith.constant 2 : index
    %c0_84 = arith.constant 0 : index
    %c0_85 = arith.constant 0 : index
    %178 = vector.load %arg7[%c2_83, %c0_84, %c0_85] : memref<4x128x128xbf16, #tpu.memory_space<vmem>>, vector<1x128x128xbf16>
    %179 = vector.shape_cast %178 : vector<1x128x128xbf16> to vector<128x128xbf16>
    %cst_86 = arith.constant dense<0.000000e+00> : vector<8x128xf32>
    %180 = tpu.matmul %177, %179, %cst_86 {dimension_numbers = #tpu.dot_dimension_numbers<[1], [0], [0], [1], [0, 0, 1, 1], [], []>} : vector<8x128xbf16>, vector<128x128xbf16>, vector<8x128xf32> -> vector<8x128xf32>
    %181 = vector.extract_strided_slice %154 {offsets = [2, 0], sizes = [1, 128], strides = [1, 1]} : vector<4x128xf32> to vector<1x128xf32>
    %182 = vector.broadcast %181 : vector<1x128xf32> to vector<8x128xf32>
    %183 = arith.addf %180, %182 : vector<8x128xf32>
    %cst_87 = arith.constant 2.000000e+01 : f32
    %184 = vector.broadcast %cst_87 : f32 to vector<8x128xf32>
    %185 = arith.cmpf ogt, %183, %184 : vector<8x128xf32>
    %cst_88 = arith.constant 2.000000e+01 : f32
    %186 = vector.broadcast %cst_88 : f32 to vector<8x128xf32>
    %187 = arith.minimumf %183, %186 : vector<8x128xf32>
    %188 = math.exp %187 : vector<8x128xf32>
    %189 = math.log1p %188 : vector<8x128xf32>
    %190 = arith.select %185, %183, %189 : vector<8x128xi1>, vector<8x128xf32>
    %191 = arith.truncf %190 : vector<8x128xf32> to vector<8x128xbf16>
    %c3_89 = arith.constant 3 : index
    %c0_90 = arith.constant 0 : index
    %c0_91 = arith.constant 0 : index
    %192 = vector.load %arg7[%c3_89, %c0_90, %c0_91] : memref<4x128x128xbf16, #tpu.memory_space<vmem>>, vector<1x128x128xbf16>
    %193 = vector.shape_cast %192 : vector<1x128x128xbf16> to vector<128x128xbf16>
    %cst_92 = arith.constant dense<0.000000e+00> : vector<8x128xf32>
    %194 = tpu.matmul %191, %193, %cst_92 {dimension_numbers = #tpu.dot_dimension_numbers<[1], [0], [0], [1], [0, 0, 1, 1], [], []>} : vector<8x128xbf16>, vector<128x128xbf16>, vector<8x128xf32> -> vector<8x128xf32>
    %195 = vector.extract_strided_slice %154 {offsets = [3, 0], sizes = [1, 128], strides = [1, 1]} : vector<4x128xf32> to vector<1x128xf32>
    %196 = vector.broadcast %195 : vector<1x128xf32> to vector<8x128xf32>
    %197 = arith.addf %194, %196 : vector<8x128xf32>
    %c0_93 = arith.constant 0 : index
    %c0_94 = arith.constant 0 : index
    %198 = vector.load %arg10[%c0_93, %c0_94] : memref<8x128xf32, #tpu.memory_space<vmem>>, vector<8x128xf32>
    tpu.vector_store %arg10[%c0_93, %c0_94], %197 {strides = array<i32>} : memref<8x128xf32, #tpu.memory_space<vmem>>, vector<8x128xf32>,
    return
  }
}

</mosaic_0001>

<bundles_post_ra>
// kernel: ginet_mtl_forward.1
= control target key start
LH: loop header
LB: loop body
LE: loop exit
PB: predicated region body
PF: predicated region fallthrough
CT: control target
= control target key end

     0   :  { %s3967_s0 = inlined_call_operand.vmem [shape: s8[128,128], index: 0, kind: input, shape index: {}]   ;;  %s3968_s1 = inlined_call_operand.vmem [shape: bf16[128,128], index: 1, kind: input, shape index: {}]   ;;  %s3969_s2 = inlined_call_operand.vmem [shape: bf16[128,128], index: 2, kind: input, shape index: {}]   ;;  %s3970_s3 = inlined_call_operand.vmem [shape: bf16[9,128,128], index: 3, kind: input, shape index: {}]   ;;  %s3971_s4 = inlined_call_operand.vmem [shape: f32[3,4,128], index: 4, kind: input, shape index: {}]   ;;  %s3972_s5 = inlined_call_operand.vmem [shape: bf16[8,128], index: 5, kind: input, shape index: {}]   ;;  %s3973_s6 = inlined_call_operand.vmem [shape: f32[8,1], index: 6, kind: input, shape index: {}]   ;;  %s3974_s7 = inlined_call_operand.vmem [shape: bf16[4,128,128], index: 7, kind: input, shape index: {}]   ;;  %s3975_s8 = inlined_call_operand.vmem [shape: f32[4,128], index: 8, kind: input, shape index: {}]   ;;  %s3976_s9 = inlined_call_operand.hbm [shape: f32[8,128], index: 9, kind: output, shape index: {0}]   ;;  %s3977_s10 = inlined_call_operand.vmem [shape: f32[8,128], index: 10, kind: output, shape index: {1}]  }
   0x1   :  { %v3027_v0 = vld [vmem:[%s3968_s1 + $0x38] sm:$0xff]  ;;  %v3026_v1 = vld [vmem:[%s3968_s1 + $0x30] sm:$0xff] }
   0x2   :  { %160 = vmatpush.bf16.msra.mxu0 %v3027_v0 }
   0x3   :  { %16 = vsyncpa [#allocation3], 0  ;;  %v3025_v2 = vld [vmem:[%s3968_s1 + $0x28] sm:$0xff]  ;;  %v3024_v3 = vld [vmem:[%s3968_s1 + $0x20] sm:$0xff]  ;;  %s3188_s13 = smov [#allocation2]  }
   0x4   :  { %v3023_v4 = vld [vmem:[%s3968_s1 + $0x18] sm:$0xff]  ;;  %v3022_v5 = vld [vmem:[%s3968_s1 + $0x10] sm:$0xff]  ;;  %v35_v6 = vld [vmem:[%s3967_s0] sm:$0xff]  ;;  %s2339_s14 = sshll.u32 %s3188_s13, 4  ;;  %s2340_s14 = int_to_ptr.vmem [resolvable:$true] %s2339_s14 }
   0x5   :  { %v39_v7 = vunpack.c.0.s8 %v35_v6  ;;  %v40_v8 = vunpack.c.1.s8 %v35_v6  ;;  %v3021_v9 = vld [vmem:[%s3968_s1 + $0x8] sm:$0xff]  ;;  %v3020_v12 = vld [vmem:[%s3968_s1] sm:$0xff]  ;;  %v41_v14 = vunpack.c.2.s8 %v35_v6  ;;  %v42_v15 = vunpack.c.3.s8 %v35_v6  ;;  %v37_v30 = vld [vmem:[%s3967_s0 + $0x10] sm:$0xff]  ;;  %s2341_s1 = sshll.u32 %s3976_s9, 4  ;;  %s2342_s1 = int_to_ptr.hbm [resolvable:$true] %s2341_s1 }
   0x6   :  { %161 = vmatpush.bf16.msra.mxu0 %v3026_v1  ;;  %v36_v19 = vld [vmem:[%s3967_s0 + $0x8] sm:$0xff]  ;;  %v47_v31 = vunpack.c.0.s8 %v37_v30  ;;  %v48_v32 = vunpack.c.1.s8 %v37_v30  ;;  %v3043_v36 = vld [vmem:[%s3970_s3 + $0x78] sm:$0xff]  ;;  %v3042_v38 = vld [vmem:[%s3970_s3 + $0x70] sm:$0xff]  ;;  %v49_v40 = vunpack.c.2.s8 %v37_v30  ;;  %v50_v41 = vunpack.c.3.s8 %v37_v30 }
   0x7   :  { %v55_v10 = vcvt.s32.f32 %v39_v7  ;;  %v56_v11 = vcvt.s32.f32 %v40_v8  ;;  %v57_v16 = vcvt.s32.f32 %v41_v14  ;;  %v58_v17 = vcvt.s32.f32 %v42_v15  ;;  %v3035_v37 = vld [vmem:[%s3970_s3 + $0x38] sm:$0xff]  ;;  %346 = vmatpush.bf16.msra.mxu1 %v3043_v36  ;;  %v3034_v39 = vld [vmem:[%s3970_s3 + $0x30] sm:$0xff]  ;;  %v3041_v42 = vld [vmem:[%s3970_s3 + $0x68] sm:$0xff] }
   0x8   :  { %v43_v20 = vunpack.c.0.s8 %v36_v19  ;;  %v44_v21 = vunpack.c.1.s8 %v36_v19  ;;  %v45_v25 = vunpack.c.2.s8 %v36_v19  ;;  %v46_v26 = vunpack.c.3.s8 %v36_v19  ;;  %443 = vmatpush.bf16.msra.mxu2 %v3035_v37  ;;  %v3033_v46 = vld [vmem:[%s3970_s3 + $0x28] sm:$0xff]  ;;  %v3040_v47 = vld [vmem:[%s3970_s3 + $0x60] sm:$0xff]  ;;  %v38_v48 = vld [vmem:[%s3967_s0 + $0x18] sm:$0xff] }
   0x9   :  { %v3271_v13 = vpack.c.bf16 %v56_v11, %v55_v10  ;;  %v3274_v18 = vpack.c.bf16 %v58_v17, %v57_v16  ;;  %v63_v33 = vcvt.s32.f32 %v47_v31  ;;  %v64_v34 = vcvt.s32.f32 %v48_v32  ;;  %v3032_v49 = vld [vmem:[%s3970_s3 + $0x20] sm:$0xff]  ;;  %v3039_v50 = vld [vmem:[%s3970_s3 + $0x58] sm:$0xff]  ;;  %v3038_v54 = vld [vmem:[%s3970_s3 + $0x50] sm:$0xff] }
   0xa   :  { %162 = vmatpush.bf16.msra.mxu0 %v3025_v2  ;;  %v59_v22 = vcvt.s32.f32 %v43_v20  ;;  %v60_v23 = vcvt.s32.f32 %v44_v21  ;;  %v61_v27 = vcvt.s32.f32 %v45_v25  ;;  %v62_v28 = vcvt.s32.f32 %v46_v26  ;;  %v3031_v53 = vld [vmem:[%s3970_s3 + $0x18] sm:$0xff]  ;;  %v3030_v57 = vld [vmem:[%s3970_s3 + $0x10] sm:$0xff]  ;;  %v3037_v59 = vld [vmem:[%s3970_s3 + $0x48] sm:$0xff] }
   0xb   :  { %v3289_v35 = vpack.c.bf16 %v64_v34, %v63_v33  ;;  %347 = vmatpush.bf16.msra.mxu1 %v3042_v38  ;;  %v65_v43 = vcvt.s32.f32 %v49_v40  ;;  %v66_v44 = vcvt.s32.f32 %v50_v41  ;;  %v51_v51 = vunpack.c.0.s8 %v38_v48  ;;  %v3029_v60 = vld [vmem:[%s3970_s3 + $0x8] sm:$0xff]  ;;  %v3036_v61 = vld [vmem:[%s3970_s3 + $0x40] sm:$0xff]  ;;  %v3367_v7 = vld [vmem:[%s3969_s2 + $0x10] sm:$0xff] }
   0xc   :  { %v3280_v24 = vpack.c.bf16 %v60_v23, %v59_v22  ;;  %v3283_v29 = vpack.c.bf16 %v62_v28, %v61_v27  ;;  %444 = vmatpush.bf16.msra.mxu2 %v3034_v39  ;;  %v52_v52 = vunpack.c.1.s8 %v38_v48  ;;  %v3028_v62 = vld [vmem:[%s3970_s3] sm:$0xff]  ;;  %v53_v63 = vunpack.c.2.s8 %v38_v48  ;;  %v3373_v11 = vld [vmem:[%s3969_s2 + $0x18] sm:$0xff]  ;;  %v3385_v21 = vld [vmem:[%s3969_s2 + $0x28] sm:$0xff] }
   0xd   :  { %v3307_v45 = vpack.c.bf16 %v66_v44, %v65_v43  ;;  %v67_v55 = vcvt.s32.f32 %v51_v51  ;;  %v54_v0 = vunpack.c.3.s8 %v38_v48  ;;  %v3352_v1 = vld [vmem:[%s3969_s2] sm:$0xff]  ;;  %v3391_v26 = vld [vmem:[%s3969_s2 + $0x30] sm:$0xff]  ;;  %v3397_v31 = vld [vmem:[%s3969_s2 + $0x38] sm:$0xff] }
   0xe   :  { %163 = vmatpush.bf16.msra.mxu0 %v3024_v3  ;;  %v68_v56 = vcvt.s32.f32 %v52_v52  ;;  %v69_v2 = vcvt.s32.f32 %v53_v63  ;;  %v3379_v16 = vld [vmem:[%s3969_s2 + $0x20] sm:$0xff]  ;;  %v3051_v34 = vld [vmem:[%s3970_s3 + $0xb8] sm:$0xff]  ;;  %v3050_v36 = vld [vmem:[%s3970_s3 + $0xb0] sm:$0xff] }
   0xf   :  { %348 = vmatpush.bf16.msra.mxu1 %v3041_v42  ;;  %v70_v3 = vcvt.s32.f32 %v54_v0  ;;  %599 = vmatpush.bf16.msra.mxu3 %v3051_v34  ;;  %v3049_v38 = vld [vmem:[%s3970_s3 + $0xa8] sm:$0xff]  ;;  %v3048_v39 = vld [vmem:[%s3970_s3 + $0xa0] sm:$0xff]  ;;  %v3047_v42 = vld [vmem:[%s3970_s3 + $0x98] sm:$0xff] }
  0x10   :  { %445 = vmatpush.bf16.msra.mxu2 %v3033_v46  ;;  %v3334_v58 = vpack.c.bf16 %v68_v56, %v67_v55  ;;  %v3046_v46 = vld [vmem:[%s3970_s3 + $0x90] sm:$0xff]  ;;  %v3427_v55 = vld [vmem:[%s3971_s4] sm:$0xf] }
  0x12   :  { %164 = vmatpush.bf16.msra.mxu0 %v3023_v4  ;;  %v3355_v4 = vpack.c.bf16 %v70_v3, %v69_v2 }
  0x13   :  { %349 = vmatpush.bf16.msra.mxu1 %v3040_v47  ;;  %600 = vmatpush.bf16.msra.mxu3 %v3050_v36  ;;  %v3045_v47 = vld [vmem:[%s3970_s3 + $0x88] sm:$0xff] }
  0x14   :  { %446 = vmatpush.bf16.msra.mxu2 %v3032_v49 }
  0x16   :  { %165 = vmatpush.bf16.msra.mxu0 %v3022_v5  ;;  %v3361_v5 = vld [vmem:[%s3969_s2 + $0x8] sm:$0xff] }
  0x17   :  { %350 = vmatpush.bf16.msra.mxu1 %v3039_v50  ;;  %601 = vmatpush.bf16.msra.mxu3 %v3049_v38  ;;  %v3044_v50 = vld [vmem:[%s3970_s3 + $0x80] sm:$0xff] }
  0x18   :  { %447 = vmatpush.bf16.msra.mxu2 %v3031_v53 }
  0x1a   :  { %166 = vmatpush.bf16.msra.mxu0 %v3021_v9 }
  0x1b   :  { %351 = vmatpush.bf16.msra.mxu1 %v3038_v54  ;;  %602 = vmatpush.bf16.msra.mxu3 %v3048_v39 }
  0x1c   :  { %448 = vmatpush.bf16.msra.mxu2 %v3030_v57  ;;  %v3430_v57 = vperm.slane %v3427_v55, 0 }
  0x1e   :  { %167 = vmatpush.bf16.msra.mxu0 %v3020_v12 }
  0x1f   :  { %352 = vmatpush.bf16.msra.mxu1 %v3037_v59  ;;  %603 = vmatpush.bf16.msra.mxu3 %v3047_v42 }
  0x20   :  { %449 = vmatpush.bf16.msra.mxu2 %v3029_v60 }
  0x21   :  { %168 = vmatmul.bf16.vlgmr.msra.gmra.mxu0 %v3271_v13 }
  0x23   :  { %353 = vmatpush.bf16.msra.mxu1 %v3036_v61  ;;  %604 = vmatpush.bf16.msra.mxu3 %v3046_v46 }
  0x24   :  { %450 = vmatpush.bf16.msra.mxu2 %v3028_v62 }
  0x26   :  { %354 = vmatmul.bf16.vlgmr.msra.gmra.mxu1 %v3352_v1 }
  0x27   :  { %605 = vmatpush.bf16.msra.mxu3 %v3045_v47 }
  0x2b   :  { %606 = vmatpush.bf16.msra.mxu3 %v3044_v50 }
  0x31   :  { %173 = vmatmul.bf16.gmra.mxu0 %v3274_v18 }
  0x36   :  { %359 = vmatmul.bf16.gmra.mxu1 %v3361_v5 }
  0x41   :  { %178 = vmatmul.bf16.gmra.mxu0 %v3280_v24 }
  0x46   :  { %364 = vmatmul.bf16.gmra.mxu1 %v3367_v7 }
  0x51   :  { %183 = vmatmul.bf16.gmra.mxu0 %v3283_v29 }
  0x56   :  { %369 = vmatmul.bf16.gmra.mxu1 %v3373_v11 }
  0x61   :  { %188 = vmatmul.bf16.gmra.mxu0 %v3289_v35 }
  0x66   :  { %374 = vmatmul.bf16.gmra.mxu1 %v3379_v16 }
  0x71   :  { %193 = vmatmul.bf16.gmra.mxu0 %v3307_v45 }
  0x76   :  { %379 = vmatmul.bf16.gmra.mxu1 %v3385_v21 }
  0x81   :  { %198 = vmatmul.bf16.gmra.mxu0 %v3334_v58 }
  0x86   :  { %384 = vmatmul.bf16.gmra.mxu1 %v3391_v26 }
  0x91   :  { %203 = vmatmul.bf16.gmra.mxu0 %v3355_v4 }
  0x96   :  { %389 = vmatmul.bf16.gmra.mxu1 %v3397_v31 }
  0x9e   :  { %v169_v6 = vpop.f32.mrf.mxu0 }
  0xa3   :  { %v355_v44 = vpop.f32.mrf.mxu1 }
  0xa6   :  { %v171_v8 = vpop.f32.mrf.mxu0 }
  0xa7   :  { %v209_v9 = vpack.c.bf16 %v171_v8, %v169_v6 }
  0xa9   :  { %451 = vmatmul.bf16.vlgmr.msra.gmra.mxu2 %v209_v9 }
  0xab   :  { %v357_v51 = vpop.f32.mrf.mxu1 }
  0xae   :  { %v174_v10 = vpop.f32.mrf.mxu0 }
  0xb3   :  { %v360_v52 = vpop.f32.mrf.mxu1 }
  0xb6   :  { %v176_v12 = vpop.f32.mrf.mxu0 }
  0xb7   :  { %v210_v14 = vpack.c.bf16 %v176_v12, %v174_v10 }
  0xb9   :  { %456 = vmatmul.bf16.gmra.mxu2 %v210_v14 }
  0xbb   :  { %v362_v54 = vpop.f32.mrf.mxu1 }
  0xbe   :  { %v179_v15 = vpop.f32.mrf.mxu0 }
  0xc3   :  { %v365_v62 = vpop.f32.mrf.mxu1 }
  0xc6   :  { %v181_v17 = vpop.f32.mrf.mxu0 }
  0xc7   :  { %v211_v19 = vpack.c.bf16 %v181_v17, %v179_v15 }
  0xc9   :  { %461 = vmatmul.bf16.gmra.mxu2 %v211_v19 }
  0xcb   :  { %v367_v8 = vpop.f32.mrf.mxu1 }
  0xce   :  { %v184_v20 = vpop.f32.mrf.mxu0 }
  0xd6   :  { %v186_v22 = vpop.f32.mrf.mxu0 }
  0xd7   :  { %v212_v23 = vpack.c.bf16 %v186_v22, %v184_v20  ;;  %v370_v20 = vpop.f32.mrf.mxu1 }
  0xd9   :  { %466 = vmatmul.bf16.gmra.mxu2 %v212_v23 }
  0xde   :  { %v189_v25 = vpop.f32.mrf.mxu0 }
  0xe6   :  { %v191_v27 = vpop.f32.mrf.mxu0 }
  0xe7   :  { %v213_v28 = vpack.c.bf16 %v191_v27, %v189_v25 }
  0xe9   :  { %471 = vmatmul.bf16.gmra.mxu2 %v213_v28  ;;  %v372_v28 = vpop.f32.mrf.mxu1 }
  0xee   :  { %v194_v30 = vpop.f32.mrf.mxu0 }
  0xf1   :  { %v375_v39 = vpop.f32.mrf.mxu1 }
  0xf6   :  { %v196_v32 = vpop.f32.mrf.mxu0 }
  0xf7   :  { %v214_v33 = vpack.c.bf16 %v196_v32, %v194_v30 }
  0xf9   :  { %476 = vmatmul.bf16.gmra.mxu2 %v214_v33  ;;  %v377_v46 = vpop.f32.mrf.mxu1 }
  0xfe   :  { %v199_v37 = vpop.f32.mrf.mxu0 }
 0x106   :  { %v201_v40 = vpop.f32.mrf.mxu0 }
 0x107   :  { %v215_v41 = vpack.c.bf16 %v201_v40, %v199_v37 }
 0x109   :  { %481 = vmatmul.bf16.gmra.mxu2 %v215_v41 }
 0x10e   :  { %v204_v43 = vpop.f32.mrf.mxu0 }
 0x116   :  { %v206_v48 = vpop.f32.mrf.mxu0 }
 0x117   :  { %v216_v49 = vpack.c.bf16 %v206_v48, %v204_v43 }
 0x119   :  { %486 = vmatmul.bf16.gmra.mxu2 %v216_v49 }
 0x12c   :  { %v452_v53 = vpop.f32.mrf.mxu2 }
 0x12d   :  { %v453_v56 = vadd.f32 %v452_v53, %v355_v44 }
 0x12f   :  { %v493_v60 = vadd.f32 %v3430_v57, %v453_v56 }
 0x131   :  { %v509_v0 = vmax.f32 %v493_v60, 0.0 }
 0x134   :  { %v454_v59 = vpop.f32.mrf.mxu2 }
 0x135   :  { %v455_v61 = vadd.f32 %v454_v59, %v357_v51 }
 0x137   :  { %v494_v63 = vadd.f32 %v3430_v57, %v455_v61 }
 0x139   :  { %v510_v2 = vmax.f32 %v494_v63, 0.0 }
 0x13b   :  { %v525_v3 = vpack.c.bf16 %v510_v2, %v509_v0 }
 0x13c   :  { %v457_v6 = vpop.f32.mrf.mxu2 }
 0x13d   :  { %607 = vmatmul.bf16.vlgmr.msra.gmra.mxu3 %v525_v3  ;;  %v458_v9 = vadd.f32 %v457_v6, %v360_v52  ;;  %v380_v52 = vpop.f32.mrf.mxu1 }
 0x13f   :  { %v495_v12 = vadd.f32 %v3430_v57, %v458_v9 }
 0x141   :  { %v511_v17 = vmax.f32 %v495_v12, 0.0 }
 0x144   :  { %v459_v10 = vpop.f32.mrf.mxu2 }
 0x145   :  { %v460_v14 = vadd.f32 %v459_v10, %v362_v54  ;;  %v382_v63 = vpop.f32.mrf.mxu1 }
 0x147   :  { %v496_v15 = vadd.f32 %v3430_v57, %v460_v14 }
 0x149   :  { %v512_v19 = vmax.f32 %v496_v15, 0.0 }
 0x14b   :  { %v526_v22 = vpack.c.bf16 %v512_v19, %v511_v17 }
 0x14c   :  { %v462_v23 = vpop.f32.mrf.mxu2 }
 0x14d   :  { %612 = vmatmul.bf16.gmra.mxu3 %v526_v22  ;;  %v463_v25 = vadd.f32 %v462_v23, %v365_v62  ;;  %v385_v9 = vpop.f32.mrf.mxu1 }
 0x14f   :  { %v497_v30 = vadd.f32 %v3430_v57, %v463_v25 }
 0x151   :  { %v513_v34 = vmax.f32 %v497_v30, 0.0 }
 0x154   :  { %v464_v27 = vpop.f32.mrf.mxu2 }
 0x155   :  { %v465_v32 = vadd.f32 %v464_v27, %v367_v8  ;;  %v387_v19 = vpop.f32.mrf.mxu1 }
 0x157   :  { %v498_v33 = vadd.f32 %v3430_v57, %v465_v32 }
 0x159   :  { %v514_v36 = vmax.f32 %v498_v33, 0.0 }
 0x15b   :  { %v527_v37 = vpack.c.bf16 %v514_v36, %v513_v34 }
 0x15c   :  { %v467_v38 = vpop.f32.mrf.mxu2 }
 0x15d   :  { %617 = vmatmul.bf16.gmra.mxu3 %v527_v37  ;;  %v468_v40 = vadd.f32 %v467_v38, %v370_v20  ;;  %v390_v32 = vpop.f32.mrf.mxu1 }
 0x15f   :  { %v499_v42 = vadd.f32 %v3430_v57, %v468_v40 }
 0x161   :  { %v515_v47 = vmax.f32 %v499_v42, 0.0 }
 0x164   :  { %v469_v41 = vpop.f32.mrf.mxu2 }
 0x165   :  { %v470_v43 = vadd.f32 %v469_v41, %v372_v28  ;;  %v392_v37 = vpop.f32.mrf.mxu1 }
 0x167   :  { %v500_v44 = vadd.f32 %v3430_v57, %v470_v43 }
 0x169   :  { %v516_v48 = vmax.f32 %v500_v44, 0.0 }
 0x16b   :  { %v528_v49 = vpack.c.bf16 %v516_v48, %v515_v47  ;;  %v550_v48 = vperm.slane %v3427_v55, 1 }
 0x16c   :  { %v472_v50 = vpop.f32.mrf.mxu2 }
 0x16d   :  { %622 = vmatmul.bf16.gmra.mxu3 %v528_v49  ;;  %v473_v51 = vadd.f32 %v472_v50, %v375_v39 }
 0x16f   :  { %v501_v54 = vadd.f32 %v3430_v57, %v473_v51 }
 0x171   :  { %v517_v60 = vmax.f32 %v501_v54, 0.0 }
 0x174   :  { %v474_v53 = vpop.f32.mrf.mxu2 }
 0x175   :  { %v475_v56 = vadd.f32 %v474_v53, %v377_v46 }
 0x177   :  { %v502_v59 = vadd.f32 %v3430_v57, %v475_v56 }
 0x179   :  { %v518_v61 = vmax.f32 %v502_v59, 0.0 }
 0x17b   :  { %v529_v62 = vpack.c.bf16 %v518_v61, %v517_v60 }
 0x17c   :  { %v477_v0 = vpop.f32.mrf.mxu2 }
 0x17d   :  { %627 = vmatmul.bf16.gmra.mxu3 %v529_v62  ;;  %v478_v2 = vadd.f32 %v477_v0, %v380_v52 }
 0x17f   :  { %v503_v6 = vadd.f32 %v3430_v57, %v478_v2 }
 0x181   :  { %v519_v12 = vmax.f32 %v503_v6, 0.0 }
 0x184   :  { %v479_v3 = vpop.f32.mrf.mxu2 }
 0x185   :  { %v480_v8 = vadd.f32 %v479_v3, %v382_v63 }
 0x187   :  { %v504_v10 = vadd.f32 %v3430_v57, %v480_v8 }
 0x189   :  { %v520_v14 = vmax.f32 %v504_v10, 0.0 }
 0x18b   :  { %v530_v15 = vpack.c.bf16 %v520_v14, %v519_v12 }
 0x18c   :  { %v482_v17 = vpop.f32.mrf.mxu2 }
 0x18d   :  { %632 = vmatmul.bf16.gmra.mxu3 %v530_v15  ;;  %v483_v20 = vadd.f32 %v482_v17, %v385_v9 }
 0x18f   :  { %v505_v23 = vadd.f32 %v3430_v57, %v483_v20 }
 0x191   :  { %v521_v28 = vmax.f32 %v505_v23, 0.0 }
 0x194   :  { %v484_v22 = vpop.f32.mrf.mxu2 }
 0x195   :  { %v485_v25 = vadd.f32 %v484_v22, %v387_v19 }
 0x197   :  { %v506_v27 = vadd.f32 %v3430_v57, %v485_v25 }
 0x199   :  { %v522_v30 = vmax.f32 %v506_v27, 0.0 }
 0x19b   :  { %v531_v33 = vpack.c.bf16 %v522_v30, %v521_v28  ;;  %v3186_v30 = vmov 128.0  }
 0x19c   :  { %v487_v34 = vpop.f32.mrf.mxu2  ;;  %3136 = vrcp.f32 %v3186_v30 }
 0x19d   :  { %637 = vmatmul.bf16.gmra.mxu3 %v531_v33  ;;  %v488_v36 = vadd.f32 %v487_v34, %v390_v32 }
 0x19f   :  { %v507_v39 = vadd.f32 %v3430_v57, %v488_v36 }
 0x1a1   :  { %v523_v42 = vmax.f32 %v507_v39, 0.0 }
 0x1a4   :  { %v489_v38 = vpop.f32.mrf.mxu2 }
 0x1a5   :  { %v490_v40 = vadd.f32 %v489_v38, %v392_v37  ;;  %v3137_v38 = vpop.eup %3136 }
 0x1a6   :  { %vm674_vm0 = vweird.f32 %v3137_v38 }
 0x1a7   :  { %v508_v41 = vadd.f32 %v3430_v57, %v490_v40 }
 0x1a9   :  { %v524_v43 = vmax.f32 %v508_v41, 0.0 }
 0x1ab   :  { %v532_v44 = vpack.c.bf16 %v524_v43, %v523_v42  ;;  %v670_v43 = vmul.f32 128.0, %v3137_v38 }
 0x1ad   :  { %642 = vmatmul.bf16.gmra.mxu3 %v532_v44 }
 0x1c0   :  { %v608_v46 = vpop.f32.mrf.mxu3 }
 0x1c1   :  { %v609_v50 = vadd.f32 %v608_v46, %v550_v48 }
 0x1c8   :  { %v610_v47 = vpop.f32.mrf.mxu3 }
 0x1c9   :  { %v611_v49 = vadd.f32 %v610_v47, %v550_v48 }
 0x1cb   :  { %v648_v52 = vadd.f32 %v611_v49, %v609_v50 }
 0x1d0   :  { %v613_v51 = vpop.f32.mrf.mxu3 }
 0x1d1   :  { %v614_v53 = vadd.f32 %v613_v51, %v550_v48 }
 0x1d3   :  { %v649_v54 = vadd.f32 %v648_v52, %v614_v53  ;;  %v671_v52 = vsub.f32 1.0, %v670_v43 }
 0x1d8   :  { %v615_v56 = vpop.f32.mrf.mxu3 }
 0x1d9   :  { %v616_v59 = vadd.f32 %v615_v56, %v550_v48 }
 0x1db   :  { %v650_v61 = vadd.f32 %v649_v54, %v616_v59 }
 0x1e0   :  { %v618_v60 = vpop.f32.mrf.mxu3 }
 0x1e1   :  { %v619_v62 = vadd.f32 %v618_v60, %v550_v48  ;;  %v672_v60 = vmul.f32 %v3137_v38, %v671_v52 }
 0x1e3   :  { %v651_v57 = vadd.f32 %v650_v61, %v619_v62 }
 0x1e8   :  { %v620_v63 = vpop.f32.mrf.mxu3 }
 0x1e9   :  { %v621_v12 = vadd.f32 %v620_v63, %v550_v48  ;;  %v673_v63 = vadd.f32 %v3137_v38, %v672_v60 }
 0x1eb   :  { %v652_v15 = vadd.f32 %v651_v57, %v621_v12 }
 0x1f0   :  { %v623_v0 = vpop.f32.mrf.mxu3 }
 0x1f1   :  { %v624_v14 = vadd.f32 %v623_v0, %v550_v48 }
 0x1f3   :  { %v653_v20 = vadd.f32 %v652_v15, %v624_v14 }
 0x1f8   :  { %v625_v2 = vpop.f32.mrf.mxu3 }
 0x1f9   :  { %v626_v17 = vadd.f32 %v625_v2, %v550_v48 }
 0x1fb   :  { %v654_v23 = vadd.f32 %v653_v20, %v626_v17 }
 0x200   :  { %v628_v3 = vpop.f32.mrf.mxu3 }
 0x201   :  { %v629_v22 = vadd.f32 %v628_v3, %v550_v48  ;;  %v3449_v3 = vsel %vm674_vm0, %v3137_v38, %v673_v63 }
 0x203   :  { %v655_v27 = vadd.f32 %v654_v23, %v629_v22 }
 0x208   :  { %v630_v6 = vpop.f32.mrf.mxu3 }
 0x209   :  { %v631_v25 = vadd.f32 %v630_v6, %v550_v48 }
 0x20b   :  { %v656_v32 = vadd.f32 %v655_v27, %v631_v25 }
 0x210   :  { %v633_v8 = vpop.f32.mrf.mxu3 }
 0x211   :  { %v634_v28 = vadd.f32 %v633_v8, %v550_v48 }
 0x213   :  { %v657_v36 = vadd.f32 %v656_v32, %v634_v28 }
 0x218   :  { %v635_v9 = vpop.f32.mrf.mxu3 }
 0x219   :  { %v636_v33 = vadd.f32 %v635_v9, %v550_v48 }
 0x21b   :  { %v658_v39 = vadd.f32 %v657_v36, %v636_v33 }
 0x220   :  { %v638_v10 = vpop.f32.mrf.mxu3 }
 0x221   :  { %v639_v37 = vadd.f32 %v638_v10, %v550_v48 }
 0x223   :  { %v659_v41 = vadd.f32 %v658_v39, %v639_v37 }
 0x228   :  { %v640_v19 = vpop.f32.mrf.mxu3 }
 0x229   :  { %v641_v40 = vadd.f32 %v640_v19, %v550_v48 }
 0x22b   :  { %v660_v44 = vadd.f32 %v659_v41, %v641_v40 }
 0x230   :  { %v643_v34 = vpop.f32.mrf.mxu3 }
 0x231   :  { %v644_v42 = vadd.f32 %v643_v34, %v550_v48 }
 0x233   :  { %v661_v47 = vadd.f32 %v660_v44, %v644_v42 }
 0x238   :  { %v645_v46 = vpop.f32.mrf.mxu3 }
 0x239   :  { %v646_v51 = vadd.f32 %v645_v46, %v550_v48 }
 0x23b   :  { %v662_v54 = vadd.f32 %v661_v47, %v646_v51 }
 0x23d   :  { %v663_v56 = vrot.slane %v662_v54, 4 }
 0x23f   :  { %v664_v61 = vadd.f32 %v663_v56, %v662_v54 }
 0x241   :  { %v665_v57 = vrot.slane %v664_v61, 2 }
 0x243   :  { %v666_v0 = vadd.f32 %v665_v57, %v664_v61 }
 0x245   :  { %v667_v2 = vrot.slane %v666_v0, 1 }
 0x247   :  { %v668_v6 = vadd.f32 %v667_v2, %v666_v0 }
 0x249   :  { %v676_v8 = vmul.f32 %v3449_v3, %v668_v6 }
 0x24b   :  { %v3452_v9 = vsub.f32 %v609_v50, %v676_v8  ;;  %v3454_v10 = vsub.f32 %v611_v49, %v676_v8  ;;  %v3456_v48 = vsub.f32 %v614_v53, %v676_v8  ;;  %v3458_v15 = vsub.f32 %v619_v62, %v676_v8 }
 0x24c   :  { %v3464_v23 = vsub.f32 %v616_v59, %v676_v8  ;;  %v3468_v50 = vsub.f32 %v621_v12, %v676_v8  ;;  %v3472_v62 = vsub.f32 %v624_v14, %v676_v8  ;;  %v3476_v36 = vsub.f32 %v626_v17, %v676_v8 }
 0x24d   :  { %v693_v19 = vmul.f32 %v3452_v9, %v3452_v9  ;;  %v694_v20 = vmul.f32 %v3454_v10, %v3454_v10  ;;  %v695_v27 = vmul.f32 %v3456_v48, %v3456_v48  ;;  %v697_v32 = vmul.f32 %v3458_v15, %v3458_v15 }
 0x24e   :  { %v696_v49 = vmul.f32 %v3464_v23, %v3464_v23  ;;  %v698_v59 = vmul.f32 %v3468_v50, %v3468_v50  ;;  %v3480_v39 = vsub.f32 %v629_v22, %v676_v8  ;;  %v699_v12 = vmul.f32 %v3472_v62, %v3472_v62 }
 0x24f   :  { %v709_v30 = vadd.f32 %v694_v20, %v693_v19  ;;  %v3484_v43 = vsub.f32 %v631_v25, %v676_v8  ;;  %v700_v14 = vmul.f32 %v3476_v36, %v3476_v36  ;;  %v687_v46 = vsub.f32 %v634_v28, %v676_v8 }
 0x250   :  { %v701_v17 = vmul.f32 %v3480_v39, %v3480_v39  ;;  %v688_v52 = vsub.f32 %v636_v33, %v676_v8  ;;  %v689_v56 = vsub.f32 %v639_v37, %v676_v8  ;;  %v690_v57 = vsub.f32 %v641_v40, %v676_v8 }
 0x251   :  { %v710_v53 = vadd.f32 %v709_v30, %v695_v27  ;;  %v702_v22 = vmul.f32 %v3484_v43, %v3484_v43  ;;  %v703_v60 = vmul.f32 %v687_v46, %v687_v46  ;;  %v691_v0 = vsub.f32 %v644_v42, %v676_v8 }
 0x252   :  { %v704_v25 = vmul.f32 %v688_v52, %v688_v52  ;;  %v705_v2 = vmul.f32 %v689_v56, %v689_v56  ;;  %v692_v19 = vsub.f32 %v646_v51, %v676_v8  ;;  %v706_v28 = vmul.f32 %v690_v57, %v690_v57 }
 0x253   :  { %v711_v34 = vadd.f32 %v710_v53, %v696_v49  ;;  %v707_v27 = vmul.f32 %v691_v0, %v691_v0 }
 0x254   :  { %v708_v49 = vmul.f32 %v692_v19, %v692_v19 }
 0x255   :  { %v712_v38 = vadd.f32 %v711_v34, %v697_v32 }
 0x257   :  { %v713_v41 = vadd.f32 %v712_v38, %v698_v59 }
 0x259   :  { %v714_v44 = vadd.f32 %v713_v41, %v699_v12 }
 0x25b   :  { %v715_v47 = vadd.f32 %v714_v44, %v700_v14 }
 0x25d   :  { %v716_v54 = vadd.f32 %v715_v47, %v701_v17 }
 0x25f   :  { %v717_v61 = vadd.f32 %v716_v54, %v702_v22 }
 0x261   :  { %v718_v63 = vadd.f32 %v717_v61, %v703_v60  ;;  %v760_v60 = vperm.slane %v3427_v55, 3 }
 0x263   :  { %v719_v6 = vadd.f32 %v718_v63, %v704_v25 }
 0x265   :  { %v720_v20 = vadd.f32 %v719_v6, %v705_v2 }
 0x267   :  { %v721_v30 = vadd.f32 %v720_v20, %v706_v28 }
 0x269   :  { %v722_v33 = vadd.f32 %v721_v30, %v707_v27 }
 0x26b   :  { %v723_v53 = vadd.f32 %v722_v33, %v708_v49 }
 0x26d   :  { %v724_v32 = vrot.slane %v723_v53, 4 }
 0x26f   :  { %v725_v34 = vadd.f32 %v724_v32, %v723_v53 }
 0x271   :  { %v726_v59 = vrot.slane %v725_v34, 2 }
 0x273   :  { %v727_v37 = vadd.f32 %v726_v59, %v725_v34 }
 0x275   :  { %v728_v38 = vrot.slane %v727_v37, 1 }
 0x277   :  { %v729_v12 = vadd.f32 %v728_v38, %v727_v37 }
 0x279   :  { %v730_v40 = vmul.f32 %v729_v12, %v3449_v3 }
 0x27b   :  { %v731_v41 = vadd.f32 1e-05, %v730_v40 }
 0x27d   :  { %3138 = vrsqrt.f32 %v731_v41  ;;  %vm738_vm2 = vweird.f32 %v731_v41 }
 0x283   :  { %v3139_v42 = vpop.eup %3138 }
 0x284   :  { %v733_v14 = vmul.f32 %v3139_v42, %v731_v41  ;;  %vm739_vm1 = vweird.f32 %v3139_v42 }
 0x285   :  { %vm740_vm3 = vmor %vm738_vm2, %vm739_vm1 }
 0x286   :  { %v734_v51 = vmul.f32 %v3139_v42, %v733_v14 }
 0x288   :  { %v735_v8 = vmul.f32 0.5, %v734_v51 }
 0x28a   :  { %v736_v44 = vsub.f32 1.5, %v735_v8 }
 0x28c   :  { %v737_v17 = vmul.f32 %v3139_v42, %v736_v44 }
 0x28e   :  { %v741_v47 = vsel %vm740_vm3, %v3139_v42, %v737_v17 }
 0x28f   :  { %v742_v22 = vmul.f32 %v741_v47, %v3427_v55 }
 0x291   :  { %v743_v54 = vperm.slane %v742_v22, 2 }
 0x293   :  { %v759_v61 = vmul.f32 %v743_v54, %v692_v19  ;;  %v758_v25 = vmul.f32 %v743_v54, %v691_v0  ;;  %v756_v63 = vmul.f32 %v743_v54, %v689_v56  ;;  %v757_v2 = vmul.f32 %v743_v54, %v690_v57 }
 0x294   :  { %v754_v6 = vmul.f32 %v743_v54, %v687_v46  ;;  %v755_v28 = vmul.f32 %v743_v54, %v688_v52  ;;  %v752_v59 = vmul.f32 %v743_v54, %v3480_v39  ;;  %v753_v37 = vmul.f32 %v743_v54, %v3484_v43 }
 0x295   :  { %v775_v20 = vadd.f32 %v760_v60, %v758_v25  ;;  %v776_v27 = vadd.f32 %v760_v60, %v759_v61  ;;  %v773_v30 = vadd.f32 %v760_v60, %v756_v63  ;;  %v774_v49 = vadd.f32 %v760_v60, %v757_v2 }
 0x296   :  { %v771_v32 = vadd.f32 %v760_v60, %v754_v6  ;;  %v772_v34 = vadd.f32 %v760_v60, %v755_v28  ;;  %v769_v46 = vadd.f32 %v760_v60, %v752_v59  ;;  %v770_v52 = vadd.f32 %v760_v60, %v753_v37  ;;  %v3057_v59 = vld [vmem:[%s3970_s3 + $0xe8] sm:$0xff]  ;;  %v3064_v37 = vld [vmem:[%s3970_s3 + $0x120] sm:$0xff] }
 0x297   :  { %v791_v33 = vmax.f32 %v775_v20, 0.0  ;;  %v792_v53 = vmax.f32 %v776_v27, 0.0  ;;  %v789_v55 = vmax.f32 %v773_v30, 0.0  ;;  %v790_v19 = vmax.f32 %v774_v49, 0.0 }
 0x298   :  { %v787_v56 = vmax.f32 %v771_v32, 0.0  ;;  %v788_v57 = vmax.f32 %v772_v34, 0.0  ;;  %v750_v12 = vmul.f32 %v743_v54, %v3472_v62  ;;  %v751_v40 = vmul.f32 %v743_v54, %v3476_v36  ;;  %v3065_v34 = vld [vmem:[%s3970_s3 + $0x128] sm:$0xff] }
 0x299   :  { %v802_v38 = vpack.c.bf16 %v792_v53, %v791_v33  ;;  %v801_v0 = vpack.c.bf16 %v790_v19, %v789_v55  ;;  %v785_v42 = vmax.f32 %v769_v46, 0.0  ;;  %v786_v14 = vmax.f32 %v770_v52, 0.0  ;;  %v3063_v55 = vld [vmem:[%s3970_s3 + $0x118] sm:$0xff]  ;;  %v3061_v46 = vld [vmem:[%s3970_s3 + $0x108] sm:$0xff] }
 0x29a   :  { %v800_v41 = vpack.c.bf16 %v788_v57, %v787_v56  ;;  %v767_v39 = vadd.f32 %v760_v60, %v750_v12  ;;  %v768_v51 = vadd.f32 %v760_v60, %v751_v40  ;;  %v748_v43 = vmul.f32 %v743_v54, %v3458_v15  ;;  %v3055_v19 = vld [vmem:[%s3970_s3 + $0xd8] sm:$0xff]  ;;  %v3062_v56 = vld [vmem:[%s3970_s3 + $0x110] sm:$0xff]  ;;  %v3053_v52 = vld [vmem:[%s3970_s3 + $0xc8] sm:$0xff] }
 0x29b   :  { %803 = vmatpush.bf16.msrb.mxu0 %v802_v38  ;;  %v749_v8 = vmul.f32 %v743_v54, %v3468_v50  ;;  %v799_v44 = vpack.c.bf16 %v786_v14, %v785_v42  ;;  %v746_v17 = vmul.f32 %v743_v54, %v3456_v48  ;;  %v747_v47 = vmul.f32 %v743_v54, %v3464_v23  ;;  %v3056_v38 = vld [vmem:[%s3970_s3 + $0xe0] sm:$0xff]  ;;  %v3054_v57 = vld [vmem:[%s3970_s3 + $0xd0] sm:$0xff] }
 0x29c   :  { %v783_v22 = vmax.f32 %v767_v39, 0.0  ;;  %v784_v62 = vmax.f32 %v768_v51, 0.0  ;;  %v765_v61 = vadd.f32 %v760_v60, %v748_v43  ;;  %v744_v63 = vmul.f32 %v743_v54, %v3452_v9  ;;  %v3067_v9 = vld [vmem:[%s3970_s3 + $0x138] sm:$0xff]  ;;  %v3052_v12 = vld [vmem:[%s3970_s3 + $0xc0] sm:$0xff] }
 0x29d   :  { %v766_v36 = vadd.f32 %v760_v60, %v749_v8  ;;  %v763_v25 = vadd.f32 %v760_v60, %v746_v17  ;;  %v745_v2 = vmul.f32 %v743_v54, %v3454_v10  ;;  %v764_v50 = vadd.f32 %v760_v60, %v747_v47  ;;  %v3059_v10 = vld [vmem:[%s3970_s3 + $0xf8] sm:$0xff]  ;;  %942 = vmatpush.bf16.msrb.mxu1 %v3067_v9  ;;  %v3066_v54 = vld [vmem:[%s3970_s3 + $0x130] sm:$0xff] }
 0x29e   :  { %v798_v6 = vpack.c.bf16 %v784_v62, %v783_v22  ;;  %v781_v15 = vmax.f32 %v765_v61, 0.0  ;;  %v761_v20 = vadd.f32 %v760_v60, %v744_v63  ;;  %1039 = vmatpush.bf16.msrb.mxu2 %v3059_v10 }
 0x29f   :  { %804 = vmatpush.bf16.msrb.mxu0 %v801_v0  ;;  %v782_v28 = vmax.f32 %v766_v36, 0.0  ;;  %v779_v48 = vmax.f32 %v763_v25, 0.0  ;;  %v780_v30 = vmax.f32 %v764_v50, 0.0  ;;  %v762_v23 = vadd.f32 %v760_v60, %v745_v2  ;;  %v3058_v60 = vld [vmem:[%s3970_s3 + $0xf0] sm:$0xff]  ;;  %v3060_v0 = vld [vmem:[%s3970_s3 + $0x100] sm:$0xff] }
 0x2a0   :  { %v777_v33 = vmax.f32 %v761_v20, 0.0 }
 0x2a1   :  { %v797_v27 = vpack.c.bf16 %v782_v28, %v781_v15  ;;  %v796_v49 = vpack.c.bf16 %v780_v30, %v779_v48  ;;  %v778_v53 = vmax.f32 %v762_v23, 0.0  ;;  %943 = vmatpush.bf16.msrb.mxu1 %v3066_v54  ;;  %v3071_v15 = vld [vmem:[%s3970_s3 + $0x158] sm:$0xff]  ;;  %v3070_v28 = vld [vmem:[%s3970_s3 + $0x150] sm:$0xff]  ;;  %v3069_v48 = vld [vmem:[%s3970_s3 + $0x148] sm:$0xff] }
 0x2a2   :  { %1040 = vmatpush.bf16.msrb.mxu2 %v3058_v60  ;;  %v3068_v30 = vld [vmem:[%s3970_s3 + $0x140] sm:$0xff] }
 0x2a3   :  { %805 = vmatpush.bf16.msrb.mxu0 %v800_v41  ;;  %v795_v32 = vpack.c.bf16 %v778_v53, %v777_v33  ;;  %v3596_v53 = vld [vmem:[%s3971_s4 + $0x4] sm:$0xf] }
 0x2a4   :  { %v3599_v9 = vperm.slane %v3596_v53, 0 }
 0x2a5   :  { %944 = vmatpush.bf16.msrb.mxu1 %v3065_v34 }
 0x2a6   :  { %1041 = vmatpush.bf16.msrb.mxu2 %v3057_v59 }
 0x2a7   :  { %806 = vmatpush.bf16.msrb.mxu0 %v799_v44 }
 0x2a9   :  { %945 = vmatpush.bf16.msrb.mxu1 %v3064_v37 }
 0x2aa   :  { %1042 = vmatpush.bf16.msrb.mxu2 %v3056_v38 }
 0x2ab   :  { %807 = vmatpush.bf16.msrb.mxu0 %v798_v6 }
 0x2ad   :  { %946 = vmatpush.bf16.msrb.mxu1 %v3063_v55 }
 0x2ae   :  { %1043 = vmatpush.bf16.msrb.mxu2 %v3055_v19 }
 0x2af   :  { %808 = vmatpush.bf16.msrb.mxu0 %v797_v27 }
 0x2b1   :  { %947 = vmatpush.bf16.msrb.mxu1 %v3062_v56 }
 0x2b2   :  { %1044 = vmatpush.bf16.msrb.mxu2 %v3054_v57 }
 0x2b3   :  { %809 = vmatpush.bf16.msrb.mxu0 %v796_v49 }
 0x2b5   :  { %948 = vmatpush.bf16.msrb.mxu1 %v3061_v46 }
 0x2b6   :  { %1045 = vmatpush.bf16.msrb.mxu2 %v3053_v52 }
 0x2b7   :  { %810 = vmatpush.bf16.msrb.mxu0 %v795_v32 }
 0x2b9   :  { %949 = vmatpush.bf16.msrb.mxu1 %v3060_v0 }
 0x2ba   :  { %811 = vmatmul.bf16.vlgmr.msrb.gmra.mxu0 %v3271_v13  ;;  %1046 = vmatpush.bf16.msrb.mxu2 %v3052_v12 }
 0x2bc   :  { %950 = vmatmul.bf16.vlgmr.msrb.gmra.mxu1 %v3352_v1 }
 0x2ca   :  { %816 = vmatmul.bf16.gmra.mxu0 %v3274_v18 }
 0x2cc   :  { %955 = vmatmul.bf16.gmra.mxu1 %v3361_v5 }
 0x2da   :  { %821 = vmatmul.bf16.gmra.mxu0 %v3280_v24 }
 0x2dc   :  { %960 = vmatmul.bf16.gmra.mxu1 %v3367_v7 }
 0x2ea   :  { %826 = vmatmul.bf16.gmra.mxu0 %v3283_v29 }
 0x2ec   :  { %965 = vmatmul.bf16.gmra.mxu1 %v3373_v11 }
 0x2fa   :  { %831 = vmatmul.bf16.gmra.mxu0 %v3289_v35 }
 0x2fc   :  { %970 = vmatmul.bf16.gmra.mxu1 %v3379_v16  ;;  %v3075_v16 = vld [vmem:[%s3970_s3 + $0x178] sm:$0xff] }
 0x2fd   :  { %1195 = vmatpush.bf16.msrb.mxu3 %v3075_v16 }
 0x30a   :  { %836 = vmatmul.bf16.gmra.mxu0 %v3307_v45 }
 0x30c   :  { %975 = vmatmul.bf16.gmra.mxu1 %v3385_v21  ;;  %v3074_v21 = vld [vmem:[%s3970_s3 + $0x170] sm:$0xff] }
 0x30d   :  { %1196 = vmatpush.bf16.msrb.mxu3 %v3074_v21 }
 0x31a   :  { %841 = vmatmul.bf16.gmra.mxu0 %v3334_v58 }
 0x31c   :  { %980 = vmatmul.bf16.gmra.mxu1 %v3391_v26  ;;  %v3073_v26 = vld [vmem:[%s3970_s3 + $0x168] sm:$0xff] }
 0x31d   :  { %1197 = vmatpush.bf16.msrb.mxu3 %v3073_v26 }
 0x32a   :  { %846 = vmatmul.bf16.gmra.mxu0 %v3355_v4 }
 0x32c   :  { %985 = vmatmul.bf16.gmra.mxu1 %v3397_v31  ;;  %v3072_v31 = vld [vmem:[%s3970_s3 + $0x160] sm:$0xff] }
 0x32d   :  { %1198 = vmatpush.bf16.msrb.mxu3 %v3072_v31 }
 0x331   :  { %1199 = vmatpush.bf16.msrb.mxu3 %v3071_v15 }
 0x335   :  { %1200 = vmatpush.bf16.msrb.mxu3 %v3070_v28 }
 0x337   :  { %v812_v40 = vpop.f32.mrf.mxu0 }
 0x339   :  { %v951_v6 = vpop.f32.mrf.mxu1  ;;  %1201 = vmatpush.bf16.msrb.mxu3 %v3069_v48 }
 0x33d   :  { %1202 = vmatpush.bf16.msrb.mxu3 %v3068_v30 }
 0x33f   :  { %v814_v41 = vpop.f32.mrf.mxu0 }
 0x340   :  { %v852_v42 = vpack.c.bf16 %v814_v41, %v812_v40 }
 0x341   :  { %v953_v27 = vpop.f32.mrf.mxu1 }
 0x342   :  { %1047 = vmatmul.bf16.vlgmr.msrb.gmra.mxu2 %v852_v42 }
 0x347   :  { %v817_v14 = vpop.f32.mrf.mxu0 }
 0x349   :  { %v956_v23 = vpop.f32.mrf.mxu1 }
 0x34f   :  { %v819_v39 = vpop.f32.mrf.mxu0 }
 0x350   :  { %v853_v51 = vpack.c.bf16 %v819_v39, %v817_v14 }
 0x351   :  { %v958_v33 = vpop.f32.mrf.mxu1 }
 0x352   :  { %1052 = vmatmul.bf16.gmra.mxu2 %v853_v51 }
 0x357   :  { %v822_v43 = vpop.f32.mrf.mxu0 }
 0x359   :  { %v961_v34 = vpop.f32.mrf.mxu1 }
 0x35f   :  { %v824_v8 = vpop.f32.mrf.mxu0 }
 0x360   :  { %v854_v1 = vpack.c.bf16 %v824_v8, %v822_v43 }
 0x361   :  { %v963_v56 = vpop.f32.mrf.mxu1 }
 0x362   :  { %1057 = vmatmul.bf16.gmra.mxu2 %v854_v1 }
 0x367   :  { %v827_v44 = vpop.f32.mrf.mxu0 }
 0x369   :  { %v966_v42 = vpop.f32.mrf.mxu1 }
 0x36f   :  { %v829_v5 = vpop.f32.mrf.mxu0 }
 0x370   :  { %v855_v17 = vpack.c.bf16 %v829_v5, %v827_v44 }
 0x371   :  { %v968_v8 = vpop.f32.mrf.mxu1 }
 0x372   :  { %1062 = vmatmul.bf16.gmra.mxu2 %v855_v17 }
 0x377   :  { %v832_v7 = vpop.f32.mrf.mxu0 }
 0x37f   :  { %v834_v47 = vpop.f32.mrf.mxu0 }
 0x380   :  { %v856_v22 = vpack.c.bf16 %v834_v47, %v832_v7 }
 0x382   :  { %1067 = vmatmul.bf16.gmra.mxu2 %v856_v22 }
 0x387   :  { %v837_v11 = vpop.f32.mrf.mxu0 }
 0x38f   :  { %v839_v62 = vpop.f32.mrf.mxu0 }
 0x390   :  { %v857_v61 = vpack.c.bf16 %v839_v62, %v837_v11  ;;  %v971_v11 = vpop.f32.mrf.mxu1 }
 0x392   :  { %1072 = vmatmul.bf16.gmra.mxu2 %v857_v61 }
 0x397   :  { %v842_v36 = vpop.f32.mrf.mxu0 }
 0x398   :  { %v973_v26 = vpop.f32.mrf.mxu1 }
 0x39f   :  { %v844_v25 = vpop.f32.mrf.mxu0 }
 0x3a0   :  { %v858_v63 = vpack.c.bf16 %v844_v25, %v842_v36  ;;  %v976_v15 = vpop.f32.mrf.mxu1 }
 0x3a2   :  { %1077 = vmatmul.bf16.gmra.mxu2 %v858_v63 }
 0x3a7   :  { %v847_v2 = vpop.f32.mrf.mxu0 }
 0x3af   :  { %v849_v50 = vpop.f32.mrf.mxu0 }
 0x3b0   :  { %v859_v20 = vpack.c.bf16 %v849_v50, %v847_v2 }
 0x3b2   :  { %1082 = vmatmul.bf16.gmra.mxu2 %v859_v20 }
 0x3c5   :  { %v1048_v49 = vpop.f32.mrf.mxu2 }
 0x3c6   :  { %v1049_v32 = vadd.f32 %v1048_v49, %v951_v6  ;;  %v978_v49 = vpop.f32.mrf.mxu1 }
 0x3c8   :  { %v1089_v54 = vadd.f32 %v3599_v9, %v1049_v32 }
 0x3ca   :  { %v1105_v37 = vmax.f32 %v1089_v54, 0.0 }
 0x3cd   :  { %v1050_v10 = vpop.f32.mrf.mxu2 }
 0x3ce   :  { %v1051_v60 = vadd.f32 %v1050_v10, %v953_v27 }
 0x3d0   :  { %v1090_v59 = vadd.f32 %v3599_v9, %v1051_v60 }
 0x3d2   :  { %v1106_v38 = vmax.f32 %v1090_v59, 0.0 }
 0x3d4   :  { %v1121_v55 = vpack.c.bf16 %v1106_v38, %v1105_v37 }
 0x3d5   :  { %v1053_v19 = vpop.f32.mrf.mxu2 }
 0x3d6   :  { %1203 = vmatmul.bf16.vlgmr.msrb.gmra.mxu3 %v1121_v55  ;;  %v1054_v57 = vadd.f32 %v1053_v19, %v956_v23 }
 0x3d8   :  { %v1091_v52 = vadd.f32 %v3599_v9, %v1054_v57 }
 0x3da   :  { %v1107_v40 = vmax.f32 %v1091_v52, 0.0 }
 0x3dd   :  { %v1055_v46 = vpop.f32.mrf.mxu2 }
 0x3de   :  { %v1056_v0 = vadd.f32 %v1055_v46, %v958_v33 }
 0x3e0   :  { %v1092_v12 = vadd.f32 %v3599_v9, %v1056_v0 }
 0x3e2   :  { %v1108_v41 = vmax.f32 %v1092_v12, 0.0 }
 0x3e4   :  { %v1122_v14 = vpack.c.bf16 %v1108_v41, %v1107_v40 }
 0x3e5   :  { %v1058_v39 = vpop.f32.mrf.mxu2 }
 0x3e6   :  { %1208 = vmatmul.bf16.gmra.mxu3 %v1122_v14  ;;  %v1059_v51 = vadd.f32 %v1058_v39, %v961_v34  ;;  %v981_v34 = vpop.f32.mrf.mxu1 }
 0x3e8   :  { %v1093_v1 = vadd.f32 %v3599_v9, %v1059_v51 }
 0x3ea   :  { %v1109_v17 = vmax.f32 %v1093_v1, 0.0 }
 0x3ed   :  { %v1060_v43 = vpop.f32.mrf.mxu2 }
 0x3ee   :  { %v1061_v44 = vadd.f32 %v1060_v43, %v963_v56  ;;  %v983_v56 = vpop.f32.mrf.mxu1 }
 0x3f0   :  { %v1094_v5 = vadd.f32 %v3599_v9, %v1061_v44 }
 0x3f2   :  { %v1110_v7 = vmax.f32 %v1094_v5, 0.0 }
 0x3f4   :  { %v1123_v47 = vpack.c.bf16 %v1110_v7, %v1109_v17 }
 0x3f5   :  { %v1063_v22 = vpop.f32.mrf.mxu2 }
 0x3f6   :  { %1213 = vmatmul.bf16.gmra.mxu3 %v1123_v47  ;;  %v1064_v62 = vadd.f32 %v1063_v22, %v966_v42  ;;  %v986_v42 = vpop.f32.mrf.mxu1 }
 0x3f8   :  { %v1095_v16 = vadd.f32 %v3599_v9, %v1064_v62  ;;  %v1146_v62 = vperm.slane %v3596_v53, 1 }
 0x3fa   :  { %v1111_v31 = vmax.f32 %v1095_v16, 0.0 }
 0x3fd   :  { %v1065_v61 = vpop.f32.mrf.mxu2 }
 0x3fe   :  { %v1066_v21 = vadd.f32 %v1065_v61, %v968_v8  ;;  %v988_v43 = vpop.f32.mrf.mxu1 }
 0x400   :  { %v1096_v36 = vadd.f32 %v3599_v9, %v1066_v21 }
 0x402   :  { %v1112_v25 = vmax.f32 %v1096_v36, 0.0 }
 0x404   :  { %v1124_v63 = vpack.c.bf16 %v1112_v25, %v1111_v31 }
 0x405   :  { %v1068_v2 = vpop.f32.mrf.mxu2 }
 0x406   :  { %1218 = vmatmul.bf16.gmra.mxu3 %v1124_v63  ;;  %v1069_v6 = vadd.f32 %v1068_v2, %v971_v11 }
 0x408   :  { %v1097_v50 = vadd.f32 %v3599_v9, %v1069_v6 }
 0x40a   :  { %v1113_v48 = vmax.f32 %v1097_v50, 0.0 }
 0x40d   :  { %v1070_v28 = vpop.f32.mrf.mxu2 }
 0x40e   :  { %v1071_v20 = vadd.f32 %v1070_v28, %v973_v26 }
 0x410   :  { %v1098_v27 = vadd.f32 %v3599_v9, %v1071_v20 }
 0x412   :  { %v1114_v30 = vmax.f32 %v1098_v27, 0.0 }
 0x414   :  { %v1125_v23 = vpack.c.bf16 %v1114_v30, %v1113_v48 }
 0x415   :  { %v1073_v33 = vpop.f32.mrf.mxu2 }
 0x416   :  { %1223 = vmatmul.bf16.gmra.mxu3 %v1125_v23  ;;  %v1074_v32 = vadd.f32 %v1073_v33, %v976_v15 }
 0x418   :  { %v1099_v54 = vadd.f32 %v3599_v9, %v1074_v32 }
 0x41a   :  { %v1115_v37 = vmax.f32 %v1099_v54, 0.0 }
 0x41d   :  { %v1075_v10 = vpop.f32.mrf.mxu2 }
 0x41e   :  { %v1076_v60 = vadd.f32 %v1075_v10, %v978_v49 }
 0x420   :  { %v1100_v59 = vadd.f32 %v3599_v9, %v1076_v60 }
 0x422   :  { %v1116_v38 = vmax.f32 %v1100_v59, 0.0 }
 0x424   :  { %v1126_v55 = vpack.c.bf16 %v1116_v38, %v1115_v37 }
 0x425   :  { %v1078_v19 = vpop.f32.mrf.mxu2 }
 0x426   :  { %1228 = vmatmul.bf16.gmra.mxu3 %v1126_v55  ;;  %v1079_v57 = vadd.f32 %v1078_v19, %v981_v34 }
 0x428   :  { %v1101_v52 = vadd.f32 %v3599_v9, %v1079_v57 }
 0x42a   :  { %v1117_v40 = vmax.f32 %v1101_v52, 0.0 }
 0x42d   :  { %v1080_v46 = vpop.f32.mrf.mxu2 }
 0x42e   :  { %v1081_v0 = vadd.f32 %v1080_v46, %v983_v56 }
 0x430   :  { %v1102_v12 = vadd.f32 %v3599_v9, %v1081_v0 }
 0x432   :  { %v1118_v41 = vmax.f32 %v1102_v12, 0.0 }
 0x434   :  { %v1127_v14 = vpack.c.bf16 %v1118_v41, %v1117_v40 }
 0x435   :  { %v1083_v39 = vpop.f32.mrf.mxu2 }
 0x436   :  { %1233 = vmatmul.bf16.gmra.mxu3 %v1127_v14  ;;  %v1084_v51 = vadd.f32 %v1083_v39, %v986_v42 }
 0x438   :  { %v1103_v1 = vadd.f32 %v3599_v9, %v1084_v51 }
 0x43a   :  { %v1119_v17 = vmax.f32 %v1103_v1, 0.0 }
 0x43d   :  { %v1085_v8 = vpop.f32.mrf.mxu2 }
 0x43e   :  { %v1086_v44 = vadd.f32 %v1085_v8, %v988_v43 }
 0x440   :  { %v1104_v5 = vadd.f32 %v3599_v9, %v1086_v44 }
 0x442   :  { %v1120_v7 = vmax.f32 %v1104_v5, 0.0 }
 0x444   :  { %v1128_v47 = vpack.c.bf16 %v1120_v7, %v1119_v17 }
 0x446   :  { %1238 = vmatmul.bf16.gmra.mxu3 %v1128_v47 }
 0x459   :  { %v1204_v22 = vpop.f32.mrf.mxu3 }
 0x45a   :  { %v1205_v16 = vadd.f32 %v1204_v22, %v1146_v62 }
 0x461   :  { %v1206_v11 = vpop.f32.mrf.mxu3 }
 0x462   :  { %v1207_v61 = vadd.f32 %v1206_v11, %v1146_v62 }
 0x464   :  { %v1244_v36 = vadd.f32 %v1207_v61, %v1205_v16 }
 0x469   :  { %v1209_v21 = vpop.f32.mrf.mxu3 }
 0x46a   :  { %v1210_v26 = vadd.f32 %v1209_v21, %v1146_v62 }
 0x46c   :  { %v1245_v31 = vadd.f32 %v1244_v36, %v1210_v26 }
 0x471   :  { %v1211_v25 = vpop.f32.mrf.mxu3 }
 0x472   :  { %v1212_v63 = vadd.f32 %v1211_v25, %v1146_v62 }
 0x474   :  { %v1246_v6 = vadd.f32 %v1245_v31, %v1212_v63 }
 0x479   :  { %v1214_v2 = vpop.f32.mrf.mxu3 }
 0x47a   :  { %v1215_v15 = vadd.f32 %v1214_v2, %v1146_v62 }
 0x47c   :  { %v1247_v9 = vadd.f32 %v1246_v6, %v1215_v15 }
 0x481   :  { %v1216_v28 = vpop.f32.mrf.mxu3 }
 0x482   :  { %v1217_v33 = vadd.f32 %v1216_v28, %v1146_v62 }
 0x484   :  { %v1248_v10 = vadd.f32 %v1247_v9, %v1217_v33 }
 0x489   :  { %v1219_v50 = vpop.f32.mrf.mxu3 }
 0x48a   :  { %v1220_v32 = vadd.f32 %v1219_v50, %v1146_v62 }
 0x48c   :  { %v1249_v34 = vadd.f32 %v1248_v10, %v1220_v32 }
 0x491   :  { %v1221_v20 = vpop.f32.mrf.mxu3 }
 0x492   :  { %v1222_v54 = vadd.f32 %v1221_v20, %v1146_v62 }
 0x494   :  { %v1250_v37 = vadd.f32 %v1249_v34, %v1222_v54 }
 0x499   :  { %v1224_v27 = vpop.f32.mrf.mxu3 }
 0x49a   :  { %v1225_v59 = vadd.f32 %v1224_v27, %v1146_v62 }
 0x49c   :  { %v1251_v55 = vadd.f32 %v1250_v37, %v1225_v59 }
 0x4a1   :  { %v1226_v48 = vpop.f32.mrf.mxu3 }
 0x4a2   :  { %v1227_v38 = vadd.f32 %v1226_v48, %v1146_v62 }
 0x4a4   :  { %v1252_v56 = vadd.f32 %v1251_v55, %v1227_v38 }
 0x4a9   :  { %v1229_v30 = vpop.f32.mrf.mxu3 }
 0x4aa   :  { %v1230_v19 = vadd.f32 %v1229_v30, %v1146_v62 }
 0x4ac   :  { %v1253_v52 = vadd.f32 %v1252_v56, %v1230_v19 }
 0x4b1   :  { %v1231_v23 = vpop.f32.mrf.mxu3 }
 0x4b2   :  { %v1232_v57 = vadd.f32 %v1231_v23, %v1146_v62 }
 0x4b4   :  { %v1254_v12 = vadd.f32 %v1253_v52, %v1232_v57 }
 0x4b9   :  { %v1234_v49 = vpop.f32.mrf.mxu3 }
 0x4ba   :  { %v1235_v0 = vadd.f32 %v1234_v49, %v1146_v62 }
 0x4bc   :  { %v1255_v41 = vadd.f32 %v1254_v12, %v1235_v0 }
 0x4c1   :  { %v1236_v60 = vpop.f32.mrf.mxu3 }
 0x4c2   :  { %v1237_v40 = vadd.f32 %v1236_v60, %v1146_v62 }
 0x4c4   :  { %v1256_v14 = vadd.f32 %v1255_v41, %v1237_v40 }
 0x4c9   :  { %v1239_v46 = vpop.f32.mrf.mxu3 }
 0x4ca   :  { %v1240_v42 = vadd.f32 %v1239_v46, %v1146_v62 }
 0x4cc   :  { %v1257_v51 = vadd.f32 %v1256_v14, %v1240_v42 }
 0x4d1   :  { %v1241_v39 = vpop.f32.mrf.mxu3 }
 0x4d2   :  { %v1242_v43 = vadd.f32 %v1241_v39, %v1146_v62 }
 0x4d4   :  { %v1258_v8 = vadd.f32 %v1257_v51, %v1242_v43 }
 0x4d6   :  { %v1259_v1 = vrot.slane %v1258_v8, 4 }
 0x4d8   :  { %v1260_v44 = vadd.f32 %v1259_v1, %v1258_v8 }
 0x4da   :  { %v1261_v5 = vrot.slane %v1260_v44, 2 }
 0x4dc   :  { %v1262_v17 = vadd.f32 %v1261_v5, %v1260_v44 }
 0x4de   :  { %v1263_v7 = vrot.slane %v1262_v17, 1 }
 0x4e0   :  { %v1264_v47 = vadd.f32 %v1263_v7, %v1262_v17 }
 0x4e2   :  { %v1265_v22 = vmul.f32 %v1264_v47, %v3449_v3 }
 0x4e4   :  { %v3619_v11 = vsub.f32 %v1205_v16, %v1265_v22  ;;  %v3621_v21 = vsub.f32 %v1207_v61, %v1265_v22  ;;  %v3623_v36 = vsub.f32 %v1210_v26, %v1265_v22  ;;  %v3625_v31 = vsub.f32 %v1215_v15, %v1265_v22 }
 0x4e5   :  { %v3631_v2 = vsub.f32 %v1212_v63, %v1265_v22  ;;  %v3635_v16 = vsub.f32 %v1217_v33, %v1265_v22  ;;  %v3639_v15 = vsub.f32 %v1220_v32, %v1265_v22  ;;  %v3643_v20 = vsub.f32 %v1222_v54, %v1265_v22 }
 0x4e6   :  { %v1282_v62 = vmul.f32 %v3619_v11, %v3619_v11  ;;  %v1283_v25 = vmul.f32 %v3621_v21, %v3621_v21  ;;  %v1284_v6 = vmul.f32 %v3623_v36, %v3623_v36  ;;  %v1286_v28 = vmul.f32 %v3625_v31, %v3625_v31 }
 0x4e7   :  { %v1285_v61 = vmul.f32 %v3631_v2, %v3631_v2  ;;  %v1287_v63 = vmul.f32 %v3635_v16, %v3635_v16  ;;  %v3647_v48 = vsub.f32 %v1225_v59, %v1265_v22  ;;  %v1288_v30 = vmul.f32 %v3639_v15, %v3639_v15 }
 0x4e8   :  { %v1298_v9 = vadd.f32 %v1283_v25, %v1282_v62  ;;  %v3651_v49 = vsub.f32 %v1227_v38, %v1265_v22  ;;  %v1289_v33 = vmul.f32 %v3643_v20, %v3643_v20  ;;  %v1276_v10 = vsub.f32 %v1230_v19, %v1265_v22 }
 0x4e9   :  { %v1290_v54 = vmul.f32 %v3647_v48, %v3647_v48  ;;  %v1277_v34 = vsub.f32 %v1232_v57, %v1265_v22  ;;  %v1278_v55 = vsub.f32 %v1235_v0, %v1265_v22  ;;  %v1279_v52 = vsub.f32 %v1237_v40, %v1265_v22 }
 0x4ea   :  { %v1299_v26 = vadd.f32 %v1298_v9, %v1284_v6  ;;  %v1291_v59 = vmul.f32 %v3651_v49, %v3651_v49  ;;  %v1292_v56 = vmul.f32 %v1276_v10, %v1276_v10  ;;  %v1280_v41 = vsub.f32 %v1240_v42, %v1265_v22 }
 0x4eb   :  { %v1293_v38 = vmul.f32 %v1277_v34, %v1277_v34  ;;  %v1294_v14 = vmul.f32 %v1278_v55, %v1278_v55  ;;  %v1281_v51 = vsub.f32 %v1242_v43, %v1265_v22  ;;  %v1295_v19 = vmul.f32 %v1279_v52, %v1279_v52 }
 0x4ec   :  { %v1300_v50 = vadd.f32 %v1299_v26, %v1285_v61  ;;  %v1296_v1 = vmul.f32 %v1280_v41, %v1280_v41 }
 0x4ed   :  { %v1297_v5 = vmul.f32 %v1281_v51, %v1281_v51 }
 0x4ee   :  { %v1301_v27 = vadd.f32 %v1300_v50, %v1286_v28 }
 0x4f0   :  { %v1302_v23 = vadd.f32 %v1301_v27, %v1287_v63 }
 0x4f2   :  { %v1303_v32 = vadd.f32 %v1302_v23, %v1288_v30  ;;  %v1349_v30 = vperm.slane %v3596_v53, 3 }
 0x4f4   :  { %v1304_v60 = vadd.f32 %v1303_v32, %v1289_v33 }
 0x4f6   :  { %v1305_v37 = vadd.f32 %v1304_v60, %v1290_v54 }
 0x4f8   :  { %v1306_v46 = vadd.f32 %v1305_v37, %v1291_v59 }
 0x4fa   :  { %v1307_v12 = vadd.f32 %v1306_v46, %v1292_v56 }
 0x4fc   :  { %v1308_v39 = vadd.f32 %v1307_v12, %v1293_v38 }
 0x4fe   :  { %v1309_v8 = vadd.f32 %v1308_v39, %v1294_v14 }
 0x500   :  { %v1310_v44 = vadd.f32 %v1309_v8, %v1295_v19 }
 0x502   :  { %v1311_v57 = vadd.f32 %v1310_v44, %v1296_v1 }
 0x504   :  { %v1312_v17 = vadd.f32 %v1311_v57, %v1297_v5 }
 0x506   :  { %v1313_v7 = vrot.slane %v1312_v17, 4 }
 0x508   :  { %v1314_v47 = vadd.f32 %v1313_v7, %v1312_v17 }
 0x50a   :  { %v1315_v62 = vrot.slane %v1314_v47, 2 }
 0x50c   :  { %v1316_v0 = vadd.f32 %v1315_v62, %v1314_v47 }
 0x50e   :  { %v1317_v25 = vrot.slane %v1316_v0, 1 }
 0x510   :  { %v1318_v6 = vadd.f32 %v1317_v25, %v1316_v0 }
 0x512   :  { %v1319_v40 = vmul.f32 %v1318_v6, %v3449_v3 }
 0x514   :  { %v1320_v9 = vadd.f32 1e-05, %v1319_v40 }
 0x516   :  { %3140 = vrsqrt.f32 %v1320_v9  ;;  %vm1327_vm5 = vweird.f32 %v1320_v9 }
 0x51c   :  { %v3141_v42 = vpop.eup %3140 }
 0x51d   :  { %v1322_v61 = vmul.f32 %v3141_v42, %v1320_v9  ;;  %vm1328_vm4 = vweird.f32 %v3141_v42 }
 0x51e   :  { %vm1329_vm6 = vmor %vm1327_vm5, %vm1328_vm4 }
 0x51f   :  { %v1323_v43 = vmul.f32 %v3141_v42, %v1322_v61 }
 0x521   :  { %v1324_v22 = vmul.f32 0.5, %v1323_v43 }
 0x523   :  { %v1325_v26 = vsub.f32 1.5, %v1324_v22 }
 0x525   :  { %v1326_v28 = vmul.f32 %v3141_v42, %v1325_v26 }
 0x527   :  { %v1330_v50 = vsel %vm1329_vm6, %v3141_v42, %v1326_v28 }
 0x528   :  { %v1331_v63 = vmul.f32 %v3596_v53, %v1330_v50 }
 0x52a   :  { %v1332_v27 = vperm.slane %v1331_v63, 2 }
 0x52c   :  { %v1348_v23 = vmul.f32 %v1332_v27, %v1281_v51  ;;  %v1347_v33 = vmul.f32 %v1332_v27, %v1280_v41  ;;  %v1345_v32 = vmul.f32 %v1332_v27, %v1278_v55  ;;  %v1346_v54 = vmul.f32 %v1332_v27, %v1279_v52 }
 0x52d   :  { %v1343_v60 = vmul.f32 %v1332_v27, %v1276_v10  ;;  %v1344_v59 = vmul.f32 %v1332_v27, %v1277_v34  ;;  %v1341_v8 = vmul.f32 %v1332_v27, %v3647_v48  ;;  %v1342_v1 = vmul.f32 %v1332_v27, %v3651_v49 }
 0x52e   :  { %v1365_v37 = vadd.f32 %v1349_v30, %v1348_v23  ;;  %v1364_v56 = vadd.f32 %v1349_v30, %v1347_v33  ;;  %v1362_v46 = vadd.f32 %v1349_v30, %v1345_v32  ;;  %v1363_v38 = vadd.f32 %v1349_v30, %v1346_v54 }
 0x52f   :  { %v1360_v39 = vadd.f32 %v1349_v30, %v1343_v60  ;;  %v1361_v19 = vadd.f32 %v1349_v30, %v1344_v59  ;;  %v1358_v10 = vadd.f32 %v1349_v30, %v1341_v8  ;;  %v1359_v34 = vadd.f32 %v1349_v30, %v1342_v1  ;;  %v3086_v59 = vld [vmem:[%s3970_s3 + $0x1d0] sm:$0xff] }
 0x530   :  { %v1381_v12 = vmax.f32 %v1365_v37, 0.0  ;;  %v1380_v14 = vmax.f32 %v1364_v56, 0.0  ;;  %v1378_v53 = vmax.f32 %v1362_v46, 0.0  ;;  %v1379_v51 = vmax.f32 %v1363_v38, 0.0  ;;  %v3078_v37 = vld [vmem:[%s3970_s3 + $0x190] sm:$0xff]  ;;  %v3085_v56 = vld [vmem:[%s3970_s3 + $0x1c8] sm:$0xff] }
 0x531   :  { %v1376_v55 = vmax.f32 %v1360_v39, 0.0  ;;  %v1377_v52 = vmax.f32 %v1361_v19, 0.0  ;;  %v1339_v5 = vmul.f32 %v1332_v27, %v3639_v15  ;;  %v1340_v57 = vmul.f32 %v1332_v27, %v3643_v20  ;;  %v3077_v46 = vld [vmem:[%s3970_s3 + $0x188] sm:$0xff]  ;;  %v3084_v38 = vld [vmem:[%s3970_s3 + $0x1c0] sm:$0xff]  ;;  %v3154_v1 = vld [vmem:[%s3969_s2 + $0x10] sm:$0xff] }
 0x532   :  { %v1391_v44 = vpack.c.bf16 %v1381_v12, %v1380_v14  ;;  %v1390_v41 = vpack.c.bf16 %v1379_v51, %v1378_v53  ;;  %v1374_v7 = vmax.f32 %v1358_v10, 0.0  ;;  %v1375_v47 = vmax.f32 %v1359_v34, 0.0  ;;  %v3076_v12 = vld [vmem:[%s3970_s3 + $0x180] sm:$0xff]  ;;  %v3153_v39 = vld [vmem:[%s3969_s2 + $0x8] sm:$0xff] }
 0x533   :  { %v1389_v17 = vpack.c.bf16 %v1377_v52, %v1376_v55  ;;  %v1356_v48 = vadd.f32 %v1349_v30, %v1339_v5  ;;  %v1357_v62 = vadd.f32 %v1349_v30, %v1340_v57  ;;  %v1337_v49 = vmul.f32 %v1332_v27, %v3625_v31  ;;  %v3152_v14 = vld [vmem:[%s3969_s2] sm:$0xff] }
 0x534   :  { %1392 = vmatpush.bf16.msra.mxu0 %v1391_v44  ;;  %v1338_v0 = vmul.f32 %v1332_v27, %v3635_v16  ;;  %v1388_v25 = vpack.c.bf16 %v1375_v47, %v1374_v7  ;;  %v1335_v6 = vmul.f32 %v1332_v27, %v3623_v36  ;;  %v1336_v40 = vmul.f32 %v1332_v27, %v3631_v2  ;;  %v3156_v34 = vld [vmem:[%s3969_s2 + $0x20] sm:$0xff] }
 0x535   :  { %v1372_v9 = vmax.f32 %v1356_v48, 0.0  ;;  %v1373_v15 = vmax.f32 %v1357_v62, 0.0  ;;  %v1354_v42 = vadd.f32 %v1349_v30, %v1337_v49  ;;  %v1333_v43 = vmul.f32 %v1332_v27, %v3619_v11  ;;  %v3091_v11 = vld [vmem:[%s3970_s3 + $0x1f8] sm:$0xff]  ;;  %v3158_v62 = vld [vmem:[%s3969_s2 + $0x30] sm:$0xff] }
 0x536   :  { %v1355_v20 = vadd.f32 %v1349_v30, %v1338_v0  ;;  %v1352_v61 = vadd.f32 %v1349_v30, %v1335_v6  ;;  %v1334_v22 = vmul.f32 %v1332_v27, %v3621_v21  ;;  %v1353_v16 = vadd.f32 %v1349_v30, %v1336_v40  ;;  %v3083_v21 = vld [vmem:[%s3970_s3 + $0x1b8] sm:$0xff]  ;;  %1531 = vmatpush.bf16.msra.mxu1 %v3091_v11  ;;  %v3080_v27 = vld [vmem:[%s3970_s3 + $0x1a0] sm:$0xff] }
 0x537   :  { %v1387_v26 = vpack.c.bf16 %v1373_v15, %v1372_v9  ;;  %v1370_v31 = vmax.f32 %v1354_v42, 0.0  ;;  %v1350_v50 = vadd.f32 %v1349_v30, %v1333_v43  ;;  %1628 = vmatpush.bf16.msra.mxu2 %v3083_v21  ;;  %v3159_v6 = vld [vmem:[%s3969_s2 + $0x38] sm:$0xff]  ;;  %v3098_v9 = vld [vmem:[%s3970_s3 + $0x230] sm:$0xff]  ;;  %v3097_v42 = vld [vmem:[%s3970_s3 + $0x228] sm:$0xff] }
 0x538   :  { %1393 = vmatpush.bf16.msra.mxu0 %v1390_v41  ;;  %v1371_v28 = vmax.f32 %v1355_v20, 0.0  ;;  %v1368_v36 = vmax.f32 %v1352_v61, 0.0  ;;  %v1369_v23 = vmax.f32 %v1353_v16, 0.0  ;;  %v1351_v2 = vadd.f32 %v1349_v30, %v1334_v22  ;;  %v3087_v30 = vld [vmem:[%s3970_s3 + $0x1d8] sm:$0xff]  ;;  %v3096_v20 = vld [vmem:[%s3970_s3 + $0x220] sm:$0xff] }
 0x539   :  { %v1366_v32 = vmax.f32 %v1350_v50, 0.0  ;;  %v3099_v40 = vld [vmem:[%s3970_s3 + $0x238] sm:$0xff] }
 0x53a   :  { %v1386_v63 = vpack.c.bf16 %v1371_v28, %v1370_v31  ;;  %v1385_v33 = vpack.c.bf16 %v1369_v23, %v1368_v36  ;;  %v1367_v54 = vmax.f32 %v1351_v2, 0.0  ;;  %1784 = vmatpush.bf16.msra.mxu3 %v3099_v40  ;;  %v3095_v31 = vld [vmem:[%s3970_s3 + $0x218] sm:$0xff]  ;;  %v3094_v28 = vld [vmem:[%s3970_s3 + $0x210] sm:$0xff]  ;;  %v3093_v36 = vld [vmem:[%s3970_s3 + $0x208] sm:$0xff] }
 0x53b   :  { %v3092_v23 = vld [vmem:[%s3970_s3 + $0x200] sm:$0xff] }
 0x53c   :  { %1394 = vmatpush.bf16.msra.mxu0 %v1389_v17  ;;  %v1384_v60 = vpack.c.bf16 %v1367_v54, %v1366_v32  ;;  %v3157_v17 = vld [vmem:[%s3969_s2 + $0x28] sm:$0xff] }
 0x53d   :  { %v3779_v54 = vld [vmem:[%s3971_s4 + $0x8] sm:$0xf] }
 0x53e   :  { %1785 = vmatpush.bf16.msra.mxu3 %v3098_v9  ;;  %v3782_v11 = vperm.slane %v3779_v54, 0 }
 0x540   :  { %1395 = vmatpush.bf16.msra.mxu0 %v1388_v25 }
 0x542   :  { %1786 = vmatpush.bf16.msra.mxu3 %v3097_v42 }
 0x544   :  { %1396 = vmatpush.bf16.msra.mxu0 %v1387_v26 }
 0x546   :  { %1787 = vmatpush.bf16.msra.mxu3 %v3096_v20 }
 0x548   :  { %1397 = vmatpush.bf16.msra.mxu0 %v1386_v63 }
 0x54a   :  { %1788 = vmatpush.bf16.msra.mxu3 %v3095_v31 }
 0x54c   :  { %1398 = vmatpush.bf16.msra.mxu0 %v1385_v33 }
 0x54e   :  { %1789 = vmatpush.bf16.msra.mxu3 %v3094_v28 }
 0x550   :  { %1399 = vmatpush.bf16.msra.mxu0 %v1384_v60 }
 0x552   :  { %1790 = vmatpush.bf16.msra.mxu3 %v3093_v36 }
 0x553   :  { %1400 = vmatmul.bf16.vlgmr.msra.gmra.mxu0 %v3271_v13  ;;  %v3090_v13 = vld [vmem:[%s3970_s3 + $0x1f0] sm:$0xff] }
 0x554   :  { %1532 = vmatpush.bf16.msra.mxu1 %v3090_v13 }
 0x556   :  { %1791 = vmatpush.bf16.msra.mxu3 %v3092_v23 }
 0x563   :  { %1405 = vmatmul.bf16.gmra.mxu0 %v3274_v18  ;;  %v3082_v18 = vld [vmem:[%s3970_s3 + $0x1b0] sm:$0xff] }
 0x564   :  { %1629 = vmatpush.bf16.msra.mxu2 %v3082_v18 }
 0x573   :  { %1410 = vmatmul.bf16.gmra.mxu0 %v3280_v24  ;;  %v3089_v24 = vld [vmem:[%s3970_s3 + $0x1e8] sm:$0xff] }
 0x574   :  { %1533 = vmatpush.bf16.msra.mxu1 %v3089_v24 }
 0x583   :  { %1415 = vmatmul.bf16.gmra.mxu0 %v3283_v29  ;;  %v3081_v29 = vld [vmem:[%s3970_s3 + $0x1a8] sm:$0xff] }
 0x584   :  { %1630 = vmatpush.bf16.msra.mxu2 %v3081_v29 }
 0x588   :  { %1631 = vmatpush.bf16.msra.mxu2 %v3080_v27 }
 0x593   :  { %1420 = vmatmul.bf16.gmra.mxu0 %v3289_v35  ;;  %v3088_v35 = vld [vmem:[%s3970_s3 + $0x1e0] sm:$0xff] }
 0x594   :  { %1534 = vmatpush.bf16.msra.mxu1 %v3088_v35 }
 0x598   :  { %1535 = vmatpush.bf16.msra.mxu1 %v3087_v30 }
 0x59c   :  { %1536 = vmatpush.bf16.msra.mxu1 %v3086_v59 }
 0x5a0   :  { %1537 = vmatpush.bf16.msra.mxu1 %v3085_v56 }
 0x5a3   :  { %1425 = vmatmul.bf16.gmra.mxu0 %v3307_v45  ;;  %v3079_v45 = vld [vmem:[%s3970_s3 + $0x198] sm:$0xff] }
 0x5a4   :  { %1632 = vmatpush.bf16.msra.mxu2 %v3079_v45  ;;  %1538 = vmatpush.bf16.msra.mxu1 %v3084_v38 }
 0x5a7   :  { %1539 = vmatmul.bf16.vlgmr.msra.gmra.mxu1 %v3152_v14 }
 0x5a8   :  { %1633 = vmatpush.bf16.msra.mxu2 %v3078_v37 }
 0x5ac   :  { %1634 = vmatpush.bf16.msra.mxu2 %v3077_v46 }
 0x5b0   :  { %1635 = vmatpush.bf16.msra.mxu2 %v3076_v12 }
 0x5b3   :  { %1430 = vmatmul.bf16.gmra.mxu0 %v3334_v58 }
 0x5b7   :  { %1544 = vmatmul.bf16.gmra.mxu1 %v3153_v39 }
 0x5c3   :  { %1435 = vmatmul.bf16.gmra.mxu0 %v3355_v4  ;;  %v3155_v4 = vld [vmem:[%s3969_s2 + $0x18] sm:$0xff] }
 0x5c7   :  { %1549 = vmatmul.bf16.gmra.mxu1 %v3154_v1 }
 0x5d0   :  { %v1401_v58 = vpop.f32.mrf.mxu0 }
 0x5d7   :  { %1554 = vmatmul.bf16.gmra.mxu1 %v3155_v4 }
 0x5d8   :  { %v1403_v19 = vpop.f32.mrf.mxu0 }
 0x5d9   :  { %v1441_v8 = vpack.c.bf16 %v1403_v19, %v1401_v58 }
 0x5db   :  { %1636 = vmatmul.bf16.vlgmr.msra.gmra.mxu2 %v1441_v8 }
 0x5e0   :  { %v1406_v44 = vpop.f32.mrf.mxu0 }
 0x5e7   :  { %1559 = vmatmul.bf16.gmra.mxu1 %v3156_v34 }
 0x5e8   :  { %v1408_v53 = vpop.f32.mrf.mxu0 }
 0x5e9   :  { %v1442_v51 = vpack.c.bf16 %v1408_v53, %v1406_v44 }
 0x5eb   :  { %1641 = vmatmul.bf16.gmra.mxu2 %v1442_v51 }
 0x5f0   :  { %v1411_v55 = vpop.f32.mrf.mxu0 }
 0x5f7   :  { %1564 = vmatmul.bf16.gmra.mxu1 %v3157_v17 }
 0x5f8   :  { %v1413_v52 = vpop.f32.mrf.mxu0 }
 0x5f9   :  { %v1443_v10 = vpack.c.bf16 %v1413_v52, %v1411_v55 }
 0x5fb   :  { %1646 = vmatmul.bf16.gmra.mxu2 %v1443_v10 }
 0x600   :  { %v1416_v41 = vpop.f32.mrf.mxu0 }
 0x607   :  { %1569 = vmatmul.bf16.gmra.mxu1 %v3158_v62 }
 0x608   :  { %v1418_v5 = vpop.f32.mrf.mxu0 }
 0x609   :  { %v1444_v57 = vpack.c.bf16 %v1418_v5, %v1416_v41 }
 0x60b   :  { %1651 = vmatmul.bf16.gmra.mxu2 %v1444_v57 }
 0x610   :  { %v1421_v7 = vpop.f32.mrf.mxu0 }
 0x617   :  { %1574 = vmatmul.bf16.gmra.mxu1 %v3159_v6 }
 0x618   :  { %v1423_v47 = vpop.f32.mrf.mxu0 }
 0x619   :  { %v1445_v48 = vpack.c.bf16 %v1423_v47, %v1421_v7 }
 0x61b   :  { %1656 = vmatmul.bf16.gmra.mxu2 %v1445_v48 }
 0x620   :  { %v1426_v49 = vpop.f32.mrf.mxu0 }
 0x624   :  { %v1540_v26 = vpop.f32.mrf.mxu1 }
 0x628   :  { %v1428_v0 = vpop.f32.mrf.mxu0 }
 0x629   :  { %v1446_v25 = vpack.c.bf16 %v1428_v0, %v1426_v49 }
 0x62b   :  { %1661 = vmatmul.bf16.gmra.mxu2 %v1446_v25 }
 0x62c   :  { %v1542_v63 = vpop.f32.mrf.mxu1 }
 0x630   :  { %v1431_v15 = vpop.f32.mrf.mxu0 }
 0x634   :  { %v1545_v2 = vpop.f32.mrf.mxu1 }
 0x638   :  { %v1433_v61 = vpop.f32.mrf.mxu0 }
 0x639   :  { %v1447_v43 = vpack.c.bf16 %v1433_v61, %v1431_v15 }
 0x63b   :  { %1666 = vmatmul.bf16.gmra.mxu2 %v1447_v43 }
 0x63c   :  { %v1547_v32 = vpop.f32.mrf.mxu1 }
 0x640   :  { %v1436_v22 = vpop.f32.mrf.mxu0 }
 0x644   :  { %v1550_v24 = vpop.f32.mrf.mxu1 }
 0x648   :  { %v1438_v16 = vpop.f32.mrf.mxu0 }
 0x649   :  { %v1448_v50 = vpack.c.bf16 %v1438_v16, %v1436_v22 }
 0x64b   :  { %1671 = vmatmul.bf16.gmra.mxu2 %v1448_v50 }
 0x64c   :  { %v1552_v59 = vpop.f32.mrf.mxu1 }
 0x654   :  { %v1555_v58 = vpop.f32.mrf.mxu1 }
 0x65c   :  { %v1557_v53 = vpop.f32.mrf.mxu1 }
 0x65e   :  { %v1637_v33 = vpop.f32.mrf.mxu2 }
 0x65f   :  { %v1638_v60 = vadd.f32 %v1637_v33, %v1540_v26 }
 0x661   :  { %v1678_v13 = vadd.f32 %v3782_v11, %v1638_v60 }
 0x663   :  { %v1694_v35 = vmax.f32 %v1678_v13, 0.0 }
 0x664   :  { %v1560_v5 = vpop.f32.mrf.mxu1 }
 0x666   :  { %v1639_v21 = vpop.f32.mrf.mxu2 }
 0x667   :  { %v1640_v18 = vadd.f32 %v1639_v21, %v1542_v63 }
 0x669   :  { %v1679_v29 = vadd.f32 %v3782_v11, %v1640_v18 }
 0x66b   :  { %v1695_v27 = vmax.f32 %v1679_v29, 0.0 }
 0x66c   :  { %v1562_v62 = vpop.f32.mrf.mxu1 }
 0x66d   :  { %v1710_v30 = vpack.c.bf16 %v1695_v27, %v1694_v35 }
 0x66e   :  { %v1642_v45 = vpop.f32.mrf.mxu2 }
 0x66f   :  { %1792 = vmatmul.bf16.vlgmr.msra.gmra.mxu3 %v1710_v30  ;;  %v1643_v37 = vadd.f32 %v1642_v45, %v1545_v2 }
 0x671   :  { %v1680_v46 = vadd.f32 %v3782_v11, %v1643_v37 }
 0x673   :  { %v1696_v14 = vmax.f32 %v1680_v46, 0.0 }
 0x674   :  { %v1565_v9 = vpop.f32.mrf.mxu1 }
 0x676   :  { %v1644_v56 = vpop.f32.mrf.mxu2 }
 0x677   :  { %v1645_v38 = vadd.f32 %v1644_v56, %v1547_v32 }
 0x679   :  { %v1681_v12 = vadd.f32 %v3782_v11, %v1645_v38 }
 0x67b   :  { %v1697_v39 = vmax.f32 %v1681_v12, 0.0 }
 0x67c   :  { %v1567_v31 = vpop.f32.mrf.mxu1 }
 0x67d   :  { %v1711_v19 = vpack.c.bf16 %v1697_v39, %v1696_v14 }
 0x67e   :  { %v1647_v8 = vpop.f32.mrf.mxu2 }
 0x67f   :  { %1797 = vmatmul.bf16.gmra.mxu3 %v1711_v19  ;;  %v1648_v1 = vadd.f32 %v1647_v8, %v1550_v24 }
 0x681   :  { %v1682_v51 = vadd.f32 %v3782_v11, %v1648_v1 }
 0x683   :  { %v1698_v52 = vmax.f32 %v1682_v51, 0.0 }
 0x684   :  { %v1570_v23 = vpop.f32.mrf.mxu1 }
 0x686   :  { %v1649_v44 = vpop.f32.mrf.mxu2 }
 0x687   :  { %v1650_v4 = vadd.f32 %v1649_v44, %v1552_v59 }
 0x689   :  { %v1683_v55 = vadd.f32 %v3782_v11, %v1650_v4 }
 0x68b   :  { %v1699_v10 = vmax.f32 %v1683_v55, 0.0 }
 0x68c   :  { %v1572_v13 = vpop.f32.mrf.mxu1 }
 0x68d   :  { %v1712_v34 = vpack.c.bf16 %v1699_v10, %v1698_v52 }
 0x68e   :  { %v1652_v41 = vpop.f32.mrf.mxu2 }
 0x68f   :  { %1802 = vmatmul.bf16.gmra.mxu3 %v1712_v34  ;;  %v1653_v57 = vadd.f32 %v1652_v41, %v1555_v58 }
 0x691   :  { %v1684_v7 = vadd.f32 %v3782_v11, %v1653_v57 }
 0x693   :  { %v1700_v49 = vmax.f32 %v1684_v7, 0.0 }
 0x694   :  { %v1575_v59 = vpop.f32.mrf.mxu1 }
 0x696   :  { %v1654_v17 = vpop.f32.mrf.mxu2 }
 0x697   :  { %v1655_v47 = vadd.f32 %v1654_v17, %v1557_v53  ;;  %v1735_v53 = vperm.slane %v3779_v54, 1 }
 0x699   :  { %v1685_v48 = vadd.f32 %v3782_v11, %v1655_v47 }
 0x69b   :  { %v1701_v0 = vmax.f32 %v1685_v48, 0.0 }
 0x69c   :  { %v1577_v38 = vpop.f32.mrf.mxu1 }
 0x69d   :  { %v1713_v25 = vpack.c.bf16 %v1701_v0, %v1700_v49 }
 0x69e   :  { %v1657_v6 = vpop.f32.mrf.mxu2 }
 0x69f   :  { %1807 = vmatmul.bf16.gmra.mxu3 %v1713_v25  ;;  %v1658_v40 = vadd.f32 %v1657_v6, %v1560_v5 }
 0x6a1   :  { %v1686_v42 = vadd.f32 %v3782_v11, %v1658_v40 }
 0x6a3   :  { %v1702_v43 = vmax.f32 %v1686_v42, 0.0 }
 0x6a6   :  { %v1659_v15 = vpop.f32.mrf.mxu2 }
 0x6a7   :  { %v1660_v20 = vadd.f32 %v1659_v15, %v1562_v62 }
 0x6a9   :  { %v1687_v61 = vadd.f32 %v3782_v11, %v1660_v20 }
 0x6ab   :  { %v1703_v22 = vmax.f32 %v1687_v61, 0.0 }
 0x6ad   :  { %v1714_v26 = vpack.c.bf16 %v1703_v22, %v1702_v43 }
 0x6ae   :  { %v1662_v28 = vpop.f32.mrf.mxu2 }
 0x6af   :  { %1812 = vmatmul.bf16.gmra.mxu3 %v1714_v26  ;;  %v1663_v16 = vadd.f32 %v1662_v28, %v1565_v9 }
 0x6b1   :  { %v1688_v63 = vadd.f32 %v3782_v11, %v1663_v16 }
 0x6b3   :  { %v1704_v33 = vmax.f32 %v1688_v63, 0.0 }
 0x6b6   :  { %v1664_v50 = vpop.f32.mrf.mxu2 }
 0x6b7   :  { %v1665_v36 = vadd.f32 %v1664_v50, %v1567_v31 }
 0x6b9   :  { %v1689_v2 = vadd.f32 %v3782_v11, %v1665_v36 }
 0x6bb   :  { %v1705_v32 = vmax.f32 %v1689_v2, 0.0 }
 0x6bd   :  { %v1715_v60 = vpack.c.bf16 %v1705_v32, %v1704_v33 }
 0x6be   :  { %v1667_v21 = vpop.f32.mrf.mxu2 }
 0x6bf   :  { %1817 = vmatmul.bf16.gmra.mxu3 %v1715_v60  ;;  %v1668_v18 = vadd.f32 %v1667_v21, %v1570_v23 }
 0x6c1   :  { %v1690_v29 = vadd.f32 %v3782_v11, %v1668_v18 }
 0x6c3   :  { %v1706_v30 = vmax.f32 %v1690_v29, 0.0 }
 0x6c6   :  { %v1669_v24 = vpop.f32.mrf.mxu2 }
 0x6c7   :  { %v1670_v35 = vadd.f32 %v1669_v24, %v1572_v13 }
 0x6c9   :  { %v1691_v27 = vadd.f32 %v3782_v11, %v1670_v35 }
 0x6cb   :  { %v1707_v45 = vmax.f32 %v1691_v27, 0.0 }
 0x6cd   :  { %v1716_v37 = vpack.c.bf16 %v1707_v45, %v1706_v30 }
 0x6ce   :  { %v1672_v56 = vpop.f32.mrf.mxu2 }
 0x6cf   :  { %1822 = vmatmul.bf16.gmra.mxu3 %v1716_v37  ;;  %v1673_v46 = vadd.f32 %v1672_v56, %v1575_v59 }
 0x6d1   :  { %v1692_v14 = vadd.f32 %v3782_v11, %v1673_v46 }
 0x6d3   :  { %v1708_v19 = vmax.f32 %v1692_v14, 0.0 }
 0x6d6   :  { %v1674_v12 = vpop.f32.mrf.mxu2 }
 0x6d7   :  { %v1675_v39 = vadd.f32 %v1674_v12, %v1577_v38 }
 0x6d9   :  { %v1693_v58 = vadd.f32 %v3782_v11, %v1675_v39 }
 0x6db   :  { %v1709_v8 = vmax.f32 %v1693_v58, 0.0 }
 0x6dd   :  { %v1717_v1 = vpack.c.bf16 %v1709_v8, %v1708_v19 }
 0x6df   :  { %1827 = vmatmul.bf16.gmra.mxu3 %v1717_v1 }
 0x6f2   :  { %v1793_v44 = vpop.f32.mrf.mxu3 }
 0x6f3   :  { %v1794_v4 = vadd.f32 %v1793_v44, %v1735_v53 }
 0x6fa   :  { %v1795_v51 = vpop.f32.mrf.mxu3 }
 0x6fb   :  { %v1796_v55 = vadd.f32 %v1795_v51, %v1735_v53 }
 0x6fd   :  { %v1833_v52 = vadd.f32 %v1796_v55, %v1794_v4 }
 0x702   :  { %v1798_v10 = vpop.f32.mrf.mxu3 }
 0x703   :  { %v1799_v34 = vadd.f32 %v1798_v10, %v1735_v53 }
 0x705   :  { %v1834_v41 = vadd.f32 %v1833_v52, %v1799_v34 }
 0x70a   :  { %v1800_v5 = vpop.f32.mrf.mxu3 }
 0x70b   :  { %v1801_v57 = vadd.f32 %v1800_v5, %v1735_v53 }
 0x70d   :  { %v1835_v17 = vadd.f32 %v1834_v41, %v1801_v57 }
 0x712   :  { %v1803_v7 = vpop.f32.mrf.mxu3 }
 0x713   :  { %v1804_v47 = vadd.f32 %v1803_v7, %v1735_v53 }
 0x715   :  { %v1836_v11 = vadd.f32 %v1835_v17, %v1804_v47 }
 0x71a   :  { %v1805_v48 = vpop.f32.mrf.mxu3 }
 0x71b   :  { %v1806_v15 = vadd.f32 %v1805_v48, %v1735_v53 }
 0x71d   :  { %v1837_v20 = vadd.f32 %v1836_v11, %v1806_v15 }
 0x722   :  { %v1808_v62 = vpop.f32.mrf.mxu3 }
 0x723   :  { %v1809_v42 = vadd.f32 %v1808_v62, %v1735_v53 }
 0x725   :  { %v1838_v22 = vadd.f32 %v1837_v20, %v1809_v42 }
 0x72a   :  { %v1810_v49 = vpop.f32.mrf.mxu3 }
 0x72b   :  { %v1811_v61 = vadd.f32 %v1810_v49, %v1735_v53 }
 0x72d   :  { %v1839_v31 = vadd.f32 %v1838_v22, %v1811_v61 }
 0x732   :  { %v1813_v0 = vpop.f32.mrf.mxu3 }
 0x733   :  { %v1814_v26 = vadd.f32 %v1813_v0, %v1735_v53 }
 0x735   :  { %v1840_v16 = vadd.f32 %v1839_v31, %v1814_v26 }
 0x73a   :  { %v1815_v25 = vpop.f32.mrf.mxu3 }
 0x73b   :  { %v1816_v28 = vadd.f32 %v1815_v25, %v1735_v53 }
 0x73d   :  { %v1841_v63 = vadd.f32 %v1840_v16, %v1816_v28 }
 0x742   :  { %v1818_v6 = vpop.f32.mrf.mxu3 }
 0x743   :  { %v1819_v50 = vadd.f32 %v1818_v6, %v1735_v53 }
 0x745   :  { %v1842_v2 = vadd.f32 %v1841_v63, %v1819_v50 }
 0x74a   :  { %v1820_v40 = vpop.f32.mrf.mxu3 }
 0x74b   :  { %v1821_v36 = vadd.f32 %v1820_v40, %v1735_v53 }
 0x74d   :  { %v1843_v32 = vadd.f32 %v1842_v2, %v1821_v36 }
 0x752   :  { %v1823_v9 = vpop.f32.mrf.mxu3 }
 0x753   :  { %v1824_v33 = vadd.f32 %v1823_v9, %v1735_v53 }
 0x755   :  { %v1844_v21 = vadd.f32 %v1843_v32, %v1824_v33 }
 0x75a   :  { %v1825_v43 = vpop.f32.mrf.mxu3 }
 0x75b   :  { %v1826_v60 = vadd.f32 %v1825_v43, %v1735_v53 }
 0x75d   :  { %v1845_v18 = vadd.f32 %v1844_v21, %v1826_v60 }
 0x762   :  { %v1828_v23 = vpop.f32.mrf.mxu3 }
 0x763   :  { %v1829_v13 = vadd.f32 %v1828_v23, %v1735_v53 }
 0x765   :  { %v1846_v29 = vadd.f32 %v1845_v18, %v1829_v13 }
 0x76a   :  { %v1830_v24 = vpop.f32.mrf.mxu3 }
 0x76b   :  { %v1831_v35 = vadd.f32 %v1830_v24, %v1735_v53 }
 0x76d   :  { %v1847_v27 = vadd.f32 %v1846_v29, %v1831_v35 }
 0x76f   :  { %v1848_v30 = vrot.slane %v1847_v27, 4 }
 0x771   :  { %v1849_v45 = vadd.f32 %v1848_v30, %v1847_v27 }
 0x773   :  { %v1850_v59 = vrot.slane %v1849_v45, 2 }
 0x775   :  { %v1851_v37 = vadd.f32 %v1850_v59, %v1849_v45 }
 0x777   :  { %v1852_v56 = vrot.slane %v1851_v37, 1 }
 0x779   :  { %v1853_v46 = vadd.f32 %v1852_v56, %v1851_v37 }
 0x77b   :  { %v1854_v38 = vmul.f32 %v1853_v46, %v3449_v3 }
 0x77d   :  { %v3802_v12 = vsub.f32 %v1794_v4, %v1854_v38  ;;  %v3804_v14 = vsub.f32 %v1796_v55, %v1854_v38  ;;  %v3806_v39 = vsub.f32 %v1799_v34, %v1854_v38  ;;  %v3808_v58 = vsub.f32 %v1801_v57, %v1854_v38 }
 0x77e   :  { %v3810_v19 = vsub.f32 %v1804_v47, %v1854_v38  ;;  %v3818_v51 = vsub.f32 %v1806_v15, %v1854_v38  ;;  %v3822_v52 = vsub.f32 %v1809_v42, %v1854_v38  ;;  %v3826_v41 = vsub.f32 %v1811_v61, %v1854_v38 }
 0x77f   :  { %v1871_v8 = vmul.f32 %v3802_v12, %v3802_v12  ;;  %v1872_v1 = vmul.f32 %v3804_v14, %v3804_v14  ;;  %v1873_v44 = vmul.f32 %v3806_v39, %v3806_v39  ;;  %v1874_v4 = vmul.f32 %v3808_v58, %v3808_v58 }
 0x780   :  { %v1875_v10 = vmul.f32 %v3810_v19, %v3810_v19  ;;  %v1876_v5 = vmul.f32 %v3818_v51, %v3818_v51  ;;  %v3830_v17 = vsub.f32 %v1814_v26, %v1854_v38  ;;  %v1877_v7 = vmul.f32 %v3822_v52, %v3822_v52 }
 0x781   :  { %v1887_v53 = vadd.f32 %v1872_v1, %v1871_v8  ;;  %v1864_v11 = vsub.f32 %v1816_v28, %v1854_v38  ;;  %v1878_v48 = vmul.f32 %v3826_v41, %v3826_v41  ;;  %v1865_v49 = vsub.f32 %v1819_v50, %v1854_v38 }
 0x782   :  { %v1879_v0 = vmul.f32 %v3830_v17, %v3830_v17  ;;  %v1866_v6 = vsub.f32 %v1821_v36, %v1854_v38  ;;  %v1867_v15 = vsub.f32 %v1824_v33, %v1854_v38  ;;  %v1868_v61 = vsub.f32 %v1826_v60, %v1854_v38 }
 0x783   :  { %v1888_v55 = vadd.f32 %v1887_v53, %v1873_v44  ;;  %v1880_v40 = vmul.f32 %v1864_v11, %v1864_v11  ;;  %v1881_v42 = vmul.f32 %v1865_v49, %v1865_v49  ;;  %v1869_v26 = vsub.f32 %v1829_v13, %v1854_v38 }
 0x784   :  { %v1882_v43 = vmul.f32 %v1866_v6, %v1866_v6  ;;  %v1883_v31 = vmul.f32 %v1867_v15, %v1867_v15  ;;  %v1870_v16 = vsub.f32 %v1831_v35, %v1854_v38  ;;  %v1884_v63 = vmul.f32 %v1868_v61, %v1868_v61 }
 0x785   :  { %v1889_v34 = vadd.f32 %v1888_v55, %v1874_v4  ;;  %v1885_v50 = vmul.f32 %v1869_v26, %v1869_v26  ;;  %v1938_v44 = vperm.slane %v3779_v54, 3 }
 0x786   :  { %v1886_v32 = vmul.f32 %v1870_v16, %v1870_v16 }
 0x787   :  { %v1890_v57 = vadd.f32 %v1889_v34, %v1875_v10 }
 0x789   :  { %v1891_v47 = vadd.f32 %v1890_v57, %v1876_v5 }
 0x78b   :  { %v1892_v62 = vadd.f32 %v1891_v47, %v1877_v7 }
 0x78d   :  { %v1893_v25 = vadd.f32 %v1892_v62, %v1878_v48  ;;  %v3107_v62 = vld [vmem:[%s3974_s7 + $0x38] sm:$0xff] }
 0x78e   :  { %2051 = vmatpush.bf16.msrb.mxu1 %v3107_v62  ;;  %v3118_v62 = vld [vmem:[%s3974_s7 + $0x90] sm:$0xff] }
 0x78f   :  { %v1894_v9 = vadd.f32 %v1893_v25, %v1879_v0 }
 0x791   :  { %v1895_v20 = vadd.f32 %v1894_v9, %v1880_v40 }
 0x793   :  { %v1896_v22 = vadd.f32 %v1895_v20, %v1881_v42 }
 0x795   :  { %v1897_v28 = vadd.f32 %v1896_v22, %v1882_v43 }
 0x797   :  { %v1898_v23 = vadd.f32 %v1897_v28, %v1883_v31 }
 0x799   :  { %v1899_v2 = vadd.f32 %v1898_v23, %v1884_v63 }
 0x79b   :  { %v1900_v21 = vadd.f32 %v1899_v2, %v1885_v50 }
 0x79d   :  { %v1901_v18 = vadd.f32 %v1900_v21, %v1886_v32 }
 0x79f   :  { %v1902_v36 = vrot.slane %v1901_v18, 4 }
 0x7a1   :  { %v1903_v24 = vadd.f32 %v1902_v36, %v1901_v18 }
 0x7a3   :  { %v1904_v29 = vrot.slane %v1903_v24, 2 }
 0x7a5   :  { %v1905_v33 = vadd.f32 %v1904_v29, %v1903_v24  ;;  %v3101_v24 = vld [vmem:[%s3974_s7 + $0x8] sm:$0xff] }
 0x7a7   :  { %v1906_v27 = vrot.slane %v1905_v33, 1 }
 0x7a9   :  { %v1907_v30 = vadd.f32 %v1906_v27, %v1905_v33  ;;  %v1955_v27 = vld [vmem:[%s3972_s5] sm:$0xf] }
 0x7ab   :  { %v1908_v60 = vmul.f32 %v1907_v30, %v3449_v3  ;;  %v3115_v30 = vld [vmem:[%s3974_s7 + $0x78] sm:$0xff] }
 0x7ac   :  { %2132 = vmatpush.bf16.msrb.mxu2 %v3115_v30 }
 0x7ad   :  { %v1909_v45 = vadd.f32 1e-05, %v1908_v60  ;;  %v3114_v60 = vld [vmem:[%s3974_s7 + $0x70] sm:$0xff] }
 0x7af   :  { %3142 = vrsqrt.f32 %v1909_v45  ;;  %vm1916_vm8 = vweird.f32 %v1909_v45 }
 0x7b0   :  { %2133 = vmatpush.bf16.msrb.mxu2 %v3114_v60 }
 0x7b5   :  { %v3143_v13 = vpop.eup %3142 }
 0x7b6   :  { %v1911_v59 = vmul.f32 %v3143_v13, %v1909_v45  ;;  %vm1917_vm7 = vweird.f32 %v3143_v13  ;;  %v3113_v45 = vld [vmem:[%s3974_s7 + $0x68] sm:$0xff] }
 0x7b7   :  { %vm1918_vm9 = vmor %vm1916_vm8, %vm1917_vm7  ;;  %2134 = vmatpush.bf16.msrb.mxu2 %v3113_v45 }
 0x7b8   :  { %v1912_v35 = vmul.f32 %v3143_v13, %v1911_v59  ;;  %v3111_v59 = vld [vmem:[%s3974_s7 + $0x58] sm:$0xff] }
 0x7ba   :  { %v1913_v37 = vmul.f32 0.5, %v1912_v35  ;;  %v3110_v35 = vld [vmem:[%s3974_s7 + $0x50] sm:$0xff] }
 0x7bc   :  { %v1914_v56 = vsub.f32 1.5, %v1913_v37 }
 0x7be   :  { %v1915_v46 = vmul.f32 %v3143_v13, %v1914_v56  ;;  %v3109_v56 = vld [vmem:[%s3974_s7 + $0x48] sm:$0xff] }
 0x7c0   :  { %v1919_v38 = vsel %vm1918_vm9, %v3143_v13, %v1915_v46  ;;  %v3112_v13 = vld [vmem:[%s3974_s7 + $0x60] sm:$0xff] }
 0x7c1   :  { %v1920_v8 = vmul.f32 %v3779_v54, %v1919_v38  ;;  %v1977_v54 = vld [vmem:[%s3973_s6] sm:$0xff]  ;;  %2135 = vmatpush.bf16.msrb.mxu2 %v3112_v13 }
 0x7c3   :  { %v1921_v1 = vperm.slane %v1920_v8, 2 }
 0x7c5   :  { %v1937_v53 = vmul.f32 %v1921_v1, %v1870_v16  ;;  %v1936_v4 = vmul.f32 %v1921_v1, %v1869_v26  ;;  %v1934_v3 = vmul.f32 %v1921_v1, %v1867_v15  ;;  %v1935_v55 = vmul.f32 %v1921_v1, %v1868_v61  ;;  %v3104_v26 = vld [vmem:[%s3974_s7 + $0x20] sm:$0xff]  ;;  %2136 = vmatpush.bf16.msrb.mxu2 %v3111_v59 }
 0x7c6   :  { %v1932_v5 = vmul.f32 %v1921_v1, %v1865_v49  ;;  %v1933_v48 = vmul.f32 %v1921_v1, %v1866_v6  ;;  %v1930_v0 = vmul.f32 %v1921_v1, %v3830_v17  ;;  %v1931_v25 = vmul.f32 %v1921_v1, %v1864_v11  ;;  %v3106_v49 = vld [vmem:[%s3974_s7 + $0x30] sm:$0xff]  ;;  %v3105_v17 = vld [vmem:[%s3974_s7 + $0x28] sm:$0xff] }
 0x7c7   :  { %v1954_v10 = vadd.f32 %v1938_v44, %v1937_v53  ;;  %v1953_v34 = vadd.f32 %v1938_v44, %v1936_v4  ;;  %v1951_v7 = vadd.f32 %v1938_v44, %v1934_v3  ;;  %v1952_v47 = vadd.f32 %v1938_v44, %v1935_v55  ;;  %2052 = vmatpush.bf16.msrb.mxu1 %v3106_v49  ;;  %v3123_v53 = vld [vmem:[%s3974_s7 + $0xb8] sm:$0xff]  ;;  %v3122_v4 = vld [vmem:[%s3974_s7 + $0xb0] sm:$0xff]  ;;  %v3121_v3 = vld [vmem:[%s3974_s7 + $0xa8] sm:$0xff] }
 0x7c8   :  { %v1949_v9 = vadd.f32 %v1938_v44, %v1932_v5  ;;  %v1950_v6 = vadd.f32 %v1938_v44, %v1933_v48  ;;  %v3187_v15 = vmov 0   ;;  %v1947_v42 = vadd.f32 %v1938_v44, %v1930_v0  ;;  %2226 = vmatpush.bf16.msrb.mxu3 %v3123_v53  ;;  %v3916_v55 = vld [vmem:[%s3975_s8] sm:$0xf]  ;;  %v3119_v48 = vld [vmem:[%s3974_s7 + $0x98] sm:$0xff]  ;;  %v3117_v0 = vld [vmem:[%s3974_s7 + $0x88] sm:$0xff] }
 0x7c9   :  { %v1963_v57 = vpack.c.bf16 %v1954_v10, %v1953_v34  ;;  %v1962_v40 = vpack.c.bf16 %v1952_v47, %v1951_v7  ;;  %3135 = vset.pattern.permute.xlu0 %v3187_v15  ;;  %v1948_v20 = vadd.f32 %v1938_v44, %v1931_v25  ;;  %v1928_v61 = vmul.f32 %v1921_v1, %v3822_v52  ;;  %v3103_v52 = vld [vmem:[%s3974_s7 + $0x18] sm:$0xff]  ;;  %v3120_v47 = vld [vmem:[%s3974_s7 + $0xa0] sm:$0xff] }
 0x7ca   :  { %1980 = vperm.xlu0 %3135, %v1977_v54   ;;  %v1961_v11 = vpack.c.bf16 %v1950_v6, %v1949_v9  ;;  %v1929_v43 = vmul.f32 %v1921_v1, %v3826_v41  ;;  %v1926_v16 = vmul.f32 %v1921_v1, %v3810_v19  ;;  %v1927_v63 = vmul.f32 %v1921_v1, %v3818_v51  ;;  %v3102_v19 = vld [vmem:[%s3974_s7 + $0x10] sm:$0xff]  ;;  %v3116_v54 = vld [vmem:[%s3974_s7 + $0x80] sm:$0xff]  ;;  %v3131_v49 = vld [vmem:[%s3974_s7 + $0xf8] sm:$0xff] }
 0x7cb   :  { %1964 = vmatpush.bf16.msrb.mxu0 %v1963_v57  ;;  %v1960_v22 = vpack.c.bf16 %v1948_v20, %v1947_v42  ;;  %2053 = vmatpush.bf16.msrb.mxu1 %v3105_v17  ;;  %v1945_v31 = vadd.f32 %v1938_v44, %v1928_v61  ;;  %v1924_v23 = vmul.f32 %v1921_v1, %v3806_v39  ;;  %v2002_v10 = vperm.slane %v3916_v55, 0 }
 0x7cc   :  { %v1946_v28 = vadd.f32 %v1938_v44, %v1929_v43  ;;  %v1943_v50 = vadd.f32 %v1938_v44, %v1926_v16  ;;  %v1944_v2 = vadd.f32 %v1938_v44, %v1927_v63  ;;  %v1925_v32 = vmul.f32 %v1921_v1, %v3808_v58  ;;  %2137 = vmatpush.bf16.msrb.mxu2 %v3110_v35 }
 0x7cd   :  { %v1922_v21 = vmul.f32 %v1921_v1, %v3802_v12  ;;  %v1941_v39 = vadd.f32 %v1938_v44, %v1924_v23  ;;  %v1923_v36 = vmul.f32 %v1921_v1, %v3804_v14  ;;  %v3100_v14 = vld [vmem:[%s3974_s7] sm:$0xff]  ;;  %2227 = vmatpush.bf16.msrb.mxu3 %v3122_v4  ;;  %v2083_v25 = vperm.slane %v3916_v55, 1  ;;  %v3130_v23 = vld [vmem:[%s3974_s7 + $0xf0] sm:$0xff] }
 0x7ce   :  { %v1959_v41 = vpack.c.bf16 %v1946_v28, %v1945_v31  ;;  %v1958_v51 = vpack.c.bf16 %v1944_v2, %v1943_v50  ;;  %v1942_v18 = vadd.f32 %v1938_v44, %v1925_v32  ;;  %v3127_v50 = vld [vmem:[%s3974_s7 + $0xd8] sm:$0xff]  ;;  %v3126_v2 = vld [vmem:[%s3974_s7 + $0xd0] sm:$0xff]  ;;  %v3125_v32 = vld [vmem:[%s3974_s7 + $0xc8] sm:$0xff]  ;;  %v2271_v35 = vperm.slane %v3916_v55, 3 }
 0x7cf   :  { %1965 = vmatpush.bf16.msrb.mxu0 %v1962_v40  ;;  %2054 = vmatpush.bf16.msrb.mxu1 %v3104_v26  ;;  %v1939_v29 = vadd.f32 %v1938_v44, %v1922_v21  ;;  %v1940_v33 = vadd.f32 %v1938_v44, %v1923_v36  ;;  %v3108_v44 = vld [vmem:[%s3974_s7 + $0x40] sm:$0xff]  ;;  %v2177_v21 = vperm.slane %v3916_v55, 2 }
 0x7d0   :  { %v1957_v58 = vpack.c.bf16 %v1942_v18, %v1941_v39  ;;  %2138 = vmatpush.bf16.msrb.mxu2 %v3109_v56 }
 0x7d1   :  { %v1956_v12 = vpack.c.bf16 %v1940_v33, %v1939_v29  ;;  %2228 = vmatpush.bf16.msrb.mxu3 %v3121_v3 }
 0x7d3   :  { %1966 = vmatpush.bf16.msrb.mxu0 %v1961_v11  ;;  %2055 = vmatpush.bf16.msrb.mxu1 %v3103_v52  ;;  %v3129_v52 = vld [vmem:[%s3974_s7 + $0xe8] sm:$0xff] }
 0x7d4   :  { %2139 = vmatpush.bf16.msrb.mxu2 %v3108_v44 }
 0x7d5   :  { %2229 = vmatpush.bf16.msrb.mxu3 %v3120_v47 }
 0x7d7   :  { %1967 = vmatpush.bf16.msrb.mxu0 %v1960_v22  ;;  %2056 = vmatpush.bf16.msrb.mxu1 %v3102_v19  ;;  %v3124_v19 = vld [vmem:[%s3974_s7 + $0xc0] sm:$0xff] }
 0x7d9   :  { %2230 = vmatpush.bf16.msrb.mxu3 %v3119_v48 }
 0x7db   :  { %1968 = vmatpush.bf16.msrb.mxu0 %v1959_v41  ;;  %2057 = vmatpush.bf16.msrb.mxu1 %v3101_v24  ;;  %v3128_v41 = vld [vmem:[%s3974_s7 + $0xe0] sm:$0xff] }
 0x7dd   :  { %2231 = vmatpush.bf16.msrb.mxu3 %v3118_v62 }
 0x7df   :  { %1969 = vmatpush.bf16.msrb.mxu0 %v1958_v51  ;;  %2058 = vmatpush.bf16.msrb.mxu1 %v3100_v14 }
 0x7e1   :  { %2232 = vmatpush.bf16.msrb.mxu3 %v3117_v0 }
 0x7e3   :  { %1970 = vmatpush.bf16.msrb.mxu0 %v1957_v58 }
 0x7e5   :  { %2233 = vmatpush.bf16.msrb.mxu3 %v3116_v54 }
 0x7e7   :  { %1971 = vmatpush.bf16.msrb.mxu0 %v1956_v12 }
 0x7ea   :  { %1972 = vmatmul.bf16.vlgmr.msrb.gmra.mxu0 %v1955_v27 }
 0x7eb   :  { %2320 = vmatpush.bf16.msra.mxu0 %v3131_v49 }
 0x7ef   :  { %2321 = vmatpush.bf16.msra.mxu0 %v3130_v23 }
 0x7f3   :  { %2322 = vmatpush.bf16.msra.mxu0 %v3129_v52 }
 0x7f7   :  { %2323 = vmatpush.bf16.msra.mxu0 %v3128_v41 }
 0x7fb   :  { %2324 = vmatpush.bf16.msra.mxu0 %v3127_v50 }
 0x7ff   :  { %2325 = vmatpush.bf16.msra.mxu0 %v3126_v2 }
 0x803   :  { %2326 = vmatpush.bf16.msra.mxu0 %v3125_v32 }
 0x807   :  { %2327 = vmatpush.bf16.msra.mxu0 %v3124_v19 }
 0x83c   :  { %v1981_v37 = vpop.permute.xlu0 %1980 }
 0x867   :  { %v1973_v46 = vpop.f32.mrf.mxu0 }
 0x868   :  { %v1983_v38 = vmul.f32 %v1981_v37, %v1973_v46 }
 0x86a   :  { %v1985_v8 = vpack.c.bf16 %v1983_v38, %v1983_v38 }
 0x86c   :  { %2059 = vmatmul.bf16.vlgmr.msrb.gmra.mxu1 %v1985_v8 }
 0x86f   :  { %v1975_v1 = vpop.f32.mrf.mxu0 }
 0x8e9   :  { %v2060_v34 = vpop.f32.mrf.mxu1 }
 0x8ea   :  { %v2061_v5 = vadd.f32 %v2060_v34, %v2002_v10 }
 0x8ec   :  { %2064 = vst [vmem:[#allocation2] sm:$0xff] %v2061_v5  ;;  %v2065_v57 = vpack.c.bf16 %v2061_v5, %v2061_v5 }
 0x8ed   :  { %2344 = dma.vmem_to_hbm [thread:$0]  %s2340_s14, 128, %s2342_s1, [#allocation3]  }
 0x8ee   :  { %2140 = vmatmul.bf16.vlgmr.msrb.gmra.mxu2 %v2065_v57 }
 0x8f1   :  { %v2062_v7 = vpop.f32.mrf.mxu1 }
 0x971   :  { %v2141_v40 = vpop.f32.mrf.mxu2 }
 0x972   :  { %v2142_v9 = vadd.f32 %v2141_v40, %v2083_v25 }
 0x974   :  { %v2146_v6 = vmin.f32 %v2142_v9, 20.0  ;;  %vm2145_vm11 = vcmp.gt.f32.partialorder %v2142_v9, 20.0 }
 0x976   :  { %v2147_v15 = vmul.f32 1.442695, %v2146_v6 }
 0x978   :  { %3144 = vpow2.f32 %v2147_v15 }
 0x979   :  { %v2143_v42 = vpop.f32.mrf.mxu2 }
 0x97e   :  { %v3145_v20 = vpop.eup %3144 }
 0x97f   :  { %v2149_v17 = vadd.f32 1.0, %v3145_v20  ;;  %v2152_v11 = vmul.f32 -0.5, %v3145_v20  ;;  %v2155_v43 = vand.u32 2147483647, %v3145_v20 }
 0x981   :  { %3146 = vlog2.f32 %v2149_v17  ;;  %v2153_v61 = vadd.f32 1.0, %v2152_v11  ;;  %vm2156_vm10 = vcmp.lt.f32.partialorder %v2155_v43, 0.0004427343 }
 0x983   :  { %v2154_v31 = vmul.f32 %v3145_v20, %v2153_v61 }
 0x987   :  { %v3147_v22 = vpop.eup %3146 }
 0x988   :  { %v2151_v26 = vmul.f32 0.6931472, %v3147_v22 }
 0x98a   :  { %v2157_v28 = vsel %vm2156_vm10, %v2154_v31, %v2151_v26 }
 0x98b   :  { %v2158_v16 = vsel %vm2145_vm11, %v2142_v9, %v2157_v28 }
 0x98c   :  { %v2159_v63 = vpack.c.bf16 %v2158_v16, %v2158_v16 }
 0x98e   :  { %2234 = vmatmul.bf16.vlgmr.msrb.gmra.mxu3 %v2159_v63 }
 0xa11   :  { %v2235_v51 = vpop.f32.mrf.mxu3 }
 0xa12   :  { %v2236_v39 = vadd.f32 %v2235_v51, %v2177_v21 }
 0xa14   :  { %v2240_v18 = vmin.f32 %v2236_v39, 20.0  ;;  %vm2239_vm13 = vcmp.gt.f32.partialorder %v2236_v39, 20.0 }
 0xa16   :  { %v2241_v36 = vmul.f32 1.442695, %v2240_v18 }
 0xa18   :  { %3148 = vpow2.f32 %v2241_v36 }
 0xa19   :  { %v2237_v24 = vpop.f32.mrf.mxu3 }
 0xa1e   :  { %v3149_v58 = vpop.eup %3148 }
 0xa1f   :  { %v2243_v29 = vadd.f32 1.0, %v3149_v58  ;;  %v2246_v33 = vmul.f32 -0.5, %v3149_v58  ;;  %v2249_v27 = vand.u32 2147483647, %v3149_v58 }
 0xa21   :  { %3150 = vlog2.f32 %v2243_v29  ;;  %v2247_v12 = vadd.f32 1.0, %v2246_v33  ;;  %vm2250_vm12 = vcmp.lt.f32.partialorder %v2249_v27, 0.0004427343 }
 0xa23   :  { %v2248_v60 = vmul.f32 %v3149_v58, %v2247_v12 }
 0xa27   :  { %v3151_v14 = vpop.eup %3150 }
 0xa28   :  { %v2245_v30 = vmul.f32 0.6931472, %v3151_v14 }
 0xa2a   :  { %v2251_v45 = vsel %vm2250_vm12, %v2248_v60, %v2245_v30 }
 0xa2b   :  { %v2252_v13 = vsel %vm2239_vm13, %v2236_v39, %v2251_v45 }
 0xa2c   :  { %v2253_v59 = vpack.c.bf16 %v2252_v13, %v2252_v13 }
 0xa2e   :  { %2328 = vmatmul.bf16.vlgmr.msra.gmra.mxu0 %v2253_v59 }
 0xaab   :  { %v2329_v37 = vpop.f32.mrf.mxu0 }
 0xaac   :  { %v2330_v56 = vadd.f32 %v2329_v37, %v2271_v35 }
 0xaae   :  { %2333 = vst [vmem:[%s3977_s10] sm:$0xff] %v2330_v56 }
 0xab3   :  { %v2331_v46 = vpop.f32.mrf.mxu0 }
 0xab4   :  { %3184 = dma.done.wait [#allocation3], 128  }
 0xab5   :  { %3185 = vsyncadd [#allocation3], 4294967168 }
 0xab6   :  { %2353 = vsyncpa [#allocation3], 1 }

</bundles_post_ra>
